<compile_context>
chip_gen: v5e
topology: v5e:2x2
jax: 0.10.0
libtpu: 0.0.40
codegen_flags: <defaults>
</compile_context>

<pallas_src>
import functools

import numpy as np
import jax
import jax.numpy as jnp
from jax.experimental import pallas as pl
from jax.experimental.pallas import tpu as pltpu


# -----------------------------------------------------------------------------
# Pallas kernel: one batch tile (TB lanes) per grid step.
# -----------------------------------------------------------------------------
def _hedge_kernel(
        # batch-tiled VMEM inputs
        x_ref,          # (n_ext, TB)    fine-grid prices, rows 0 .. lag*n1
        x0_ref,         # (1,     TB)    initial prices
        # time-only VMEM columns (block index constant across tiles)
        k_ref,          # (n_ext, 1)     (theta0/theta) * exp((r_bD - r_cE) * ts)
        paya_ref,       # (n_coarse, 1)  exp(r_cE * disc)           (row 0 unused)
        payb_ref,       # (n_coarse, 1)  theta0 * exp(r_bD * disc)  (row 0 unused)
        gcum_ref,       # (n_coarse, 1)  [0, cumsum(per-step gas)]
        # time-only SMEM scalar tables
        hedge_s,        # (n1,)  exp(r_cE * disc[i])
        apos_s,         # (n1,)  1 + r_cD * h_i
        aneg_s,         # (n1,)  1 + r_bD * h_i
        ccoef_s,        # (n1,)  (1+r_cE h)*max(hedge,0) + (1+r_bE h)*min(hedge,0)
        vinit_s,        # (1,)   x0[0,0] * (1 - theta0)
        # outputs
        v_ref, payoff_ref, cost_ref,       # (n_coarse, TB) each
        # scratch
        notliq_ref,     # (n_coarse, TB)  running not-liquidated mask
        xc_ref,         # (n_coarse, TB)  coarse prices staged by the serial loop
        *, n_coarse, lag):
    n1 = n_coarse - 1
    n_ext = x_ref.shape[0]
    tb = x_ref.shape[1]

    x0_row = x0_ref[...]                         # (1, TB)
    v_init = vinit_s[0]                          # scalar from SMEM

    # ---------------- vectorized barrier pre-pass (bf16 MXU) ----------------
    # hit at fine step t:  theta*P_t*e^{r_cE t} <= theta0*P0*e^{r_bD t}
    #                 <=>  P_t <= P0 * k(t),   k(t) = (theta0/theta) e^{(r_bD-r_cE) t}
    # 0/1 values are exact in bf16; accumulation stays in f32.
    # NOTE: padded lanes (P=0, P0=0) satisfy the condition -> not_liq=0 -> outputs 0;
    # those lanes are sliced off in the wrapper.
    cond = jnp.where(x_ref[...] <= x0_row * k_ref[...], 1.0, 0.0
                     ).astype(jnp.bfloat16)                        # (n_ext, TB)
    # prefix[i, t] = 1 iff t < lag*i  (generated in-kernel: no DMA, no double buffer).
    # Row 0 is all-zero -> not_liq row 0 == 1.  Column n_ext-1 is never selected.
    row_i = jax.lax.broadcasted_iota(jnp.int32, (n_coarse, n_ext), 0)
    col_t = jax.lax.broadcasted_iota(jnp.int32, (n_coarse, n_ext), 1)
    prefix = jnp.where(col_t < lag * row_i, 1.0, 0.0).astype(jnp.bfloat16)
    hits = jnp.dot(prefix, cond, preferred_element_type=jnp.float32)   # (n_coarse, TB)
    notliq_ref[...] = jnp.where(hits > 0.5, 0.0, 1.0)

    # ---------------- serial v recurrence (the only sequential part) --------
    row0 = jnp.full((1, tb), v_init, dtype=jnp.float32)
    v_ref[pl.ds(0, 1), :] = row0
    p0 = x_ref[pl.ds(0, 1), :]
    xc_ref[pl.ds(0, 1), :] = p0                  # stage coarse prices for later

    def body(i, carry):
        v_prev, p = carry                        # carried in vregs (v and price)
        p_new = x_ref[pl.ds((i + 1) * lag, 1), :]          # 1 new price row / step
        nl = notliq_ref[pl.ds(i + 1, 1), :]                # 1 mask row / step
        resid = v_prev - hedge_s[i] * p
        v_new = (apos_s[i] * jnp.maximum(resid, 0.0)
                 + aneg_s[i] * jnp.minimum(resid, 0.0)
                 + ccoef_s[i] * p_new) * nl
        v_ref[pl.ds(i + 1, 1), :] = v_new
        xc_ref[pl.ds(i + 1, 1), :] = p_new
        return (v_new, p_new)

    jax.lax.fori_loop(0, n1, body, (row0, p0), unroll=min(8, n1))

    # ------- vectorized payoff / cost: single aligned full-block stores -------
    is0 = jax.lax.broadcasted_iota(jnp.int32, (n_coarse, tb), 0) == 0
    nl_full = notliq_ref[...]
    xc = xc_ref[...]
    payoff_ref[...] = jnp.where(
        is0, v_init,
        nl_full * (xc * paya_ref[...] - x0_row * payb_ref[...]))
    # cost_{i} = not_liq_{i-1} * cumsum(g)_{i-1}: closed form valid because the
    # running "any" makes not_liq monotone non-increasing in time.
    cost_ref[...] = jnp.where(is0, 0.0, nl_full * gcum_ref[...])


# -----------------------------------------------------------------------------
# Generation-aware VMEM budget and batch-tile selection.
# -----------------------------------------------------------------------------
def _vmem_limit_bytes():
    # v4 / v5e / v6e have 128 MiB of VMEM per core; v7x has 64 MiB per TensorCore.
    # Default to the conservative v7x-safe value when the device kind is unknown.
    kind = ""
    try:
        kind = jax.devices()[0].device_kind.lower()
    except Exception:
        pass
    if ("v4" in kind) or ("v5" in kind) or ("v6" in kind):
        return 96 * 1024 * 1024
    return 44 * 1024 * 1024


def _choose_batch_tile(b_ceil128, n_ext, n_coarse, vmem_limit, requested=None):
    if requested is not None:
        tb = max(128, (int(requested) // 128) * 128)
        return int(min(tb, b_ceil128))
    budget = int(vmem_limit * 0.55)              # leave headroom below the limit
    # lane-independent bytes: small f32 columns (double-buffered) + in-kernel
    # bf16 prefix / hit transients
    fixed = 8 * 4 * (n_ext + 3 * n_coarse) + 2 * n_coarse * n_ext + 1024
    # per-lane f32 bytes: fine input (x2 buf), 3 outputs (x2 buf), 2 scratch slabs,
    # bf16 cond + misc full-block transients
    per_lane = (4 * (2 * n_ext + 6 * n_coarse + 2 * n_coarse)
                + 2 * n_ext + 16 * n_coarse)
    tb = (max(budget - fixed, 0) // max(per_lane, 1)) // 128 * 128
    tb = max(128, tb)
    # guarantee >=2 grid tiles whenever possible so the ("parallel",) axis can be
    # split across v7x's two TensorCores (and pipelining has >1 step).
    if b_ceil128 >= 256:
        tb = min(tb, max(128, (b_ceil128 // 2) // 128 * 128))
    return int(min(tb, b_ceil128))


# -----------------------------------------------------------------------------
# Wrapper: time-only precomputation, batch padding/tiling, pallas_call.
# -----------------------------------------------------------------------------
def delta_hedge_barrier_forward(ts, lag, x0, paths_tm, *, r_cD, r_bD, r_cE, r_bE,
                                theta0, theta, mean_gas_fees, batch_tile=None):
    """
    ts       : (n_steps,)     float32 time grid
    x0       : (B, 1)         float32 initial prices
    paths_tm : (n_steps, B)   float32 simulated prices, TIME-MAJOR (lane-dense)
    returns v, payoff, cost each of shape (B, n_coarse, 1),  n_coarse = len(ts[::lag])
    """
    ts = jnp.asarray(ts, jnp.float32)
    x0 = jnp.asarray(x0, jnp.float32)
    paths_tm = jnp.asarray(paths_tm, jnp.float32)

    B = x0.shape[0]
    disc = ts[::lag]                       # (n_coarse,)
    n_coarse = int(disc.shape[0])
    assert n_coarse >= 2, "need at least 2 coarse steps"
    n1 = n_coarse - 1
    n_ext = lag * n1 + 1                   # barrier window + final coarse price row
    assert n_ext <= paths_tm.shape[0]

    # ---------------- time-only precomputation (outside the kernel) ----------------
    hedge = jnp.exp(r_cE * disc)                                   # (n_coarse,)
    h = disc[1:] - disc[:-1]                                       # (n1,)
    apos = (1.0 + r_cD * h).astype(jnp.float32)
    aneg = (1.0 + r_bD * h).astype(jnp.float32)
    ccoef = ((1.0 + r_cE * h) * jnp.maximum(hedge[:-1], 0.0)
             + (1.0 + r_bE * h) * jnp.minimum(hedge[:-1], 0.0)).astype(jnp.float32)
    change = jnp.concatenate([hedge[:1], hedge[1:n1] - hedge[:n1 - 1]])
    g = mean_gas_fees * (1.0 - jnp.exp(-10.0 * change * change))
    gcum_full = jnp.concatenate(
        [jnp.zeros((1,), jnp.float32), jnp.cumsum(g).astype(jnp.float32)])[:, None]

    # fused barrier threshold column (replaces the two lhs/rhs columns)
    k_col = ((theta0 / theta)
             * jnp.exp((r_bD - r_cE) * ts[:n_ext])).astype(jnp.float32)[:, None]
    paya_col = jnp.exp(r_cE * disc).astype(jnp.float32)[:, None]          # row 0 unused
    payb_col = (theta0 * jnp.exp(r_bD * disc)).astype(jnp.float32)[:, None]

    hedge01 = hedge[:n1].astype(jnp.float32)
    # v_init = x0[0,0]*(1-theta0) for every lane (matches the PyTorch module even
    # when x0 varies across the batch).
    vinit_arr = (x0[0, 0] * (1.0 - theta0)).astype(jnp.float32).reshape(1)

    # ---------------- batch padding / tiling (lane-dense) ----------------
    vmem_limit = _vmem_limit_bytes()
    b_ceil128 = ((B + 127) // 128) * 128
    tb = _choose_batch_tile(b_ceil128, n_ext, n_coarse, vmem_limit, batch_tile)
    b_pad = ((B + tb - 1) // tb) * tb
    pad = b_pad - B

    x_ext = paths_tm[:n_ext]                                       # (n_ext, B), no transpose
    x0_lane = x0[:, 0]
    if pad:
        # padded lanes (x=0, x0=0) trip the barrier and produce zeros; sliced off below.
        x_ext = jnp.pad(x_ext, ((0, 0), (0, pad)))
        x0_lane = jnp.pad(x0_lane, (0, pad))
    x0_row = x0_lane[None, :]                                      # (1, b_pad)

    grid = (b_pad // tb,)
    kernel = functools.partial(_hedge_kernel, n_coarse=n_coarse, lag=lag)

    v_tm, payoff_tm, cost_tm = pl.pallas_call(
        kernel,
        grid=grid,
        out_shape=(
            jax.ShapeDtypeStruct((n_coarse, b_pad), jnp.float32),
            jax.ShapeDtypeStruct((n_coarse, b_pad), jnp.float32),
            jax.ShapeDtypeStruct((n_coarse, b_pad), jnp.float32),
        ),
        in_specs=[
            # batch-tiled VMEM inputs
            pl.BlockSpec((n_ext, tb), lambda b: (0, b)),           # fine prices
            pl.BlockSpec((1, tb), lambda b: (0, b)),               # x0 row
            # time-only columns (same block for every tile)
            pl.BlockSpec((n_ext, 1), lambda b: (0, 0)),            # k_col
            pl.BlockSpec((n_coarse, 1), lambda b: (0, 0)),         # paya_col
            pl.BlockSpec((n_coarse, 1), lambda b: (0, 0)),         # payb_col
            pl.BlockSpec((n_coarse, 1), lambda b: (0, 0)),         # gcum_full
            # SMEM scalar tables for the serial loop
            pl.BlockSpec(memory_space=pltpu.MemorySpace.SMEM),     # hedge01
            pl.BlockSpec(memory_space=pltpu.MemorySpace.SMEM),     # apos
            pl.BlockSpec(memory_space=pltpu.MemorySpace.SMEM),     # aneg
            pl.BlockSpec(memory_space=pltpu.MemorySpace.SMEM),     # ccoef
            pl.BlockSpec(memory_space=pltpu.MemorySpace.SMEM),     # vinit
        ],
        out_specs=(
            pl.BlockSpec((n_coarse, tb), lambda b: (0, b)),
            pl.BlockSpec((n_coarse, tb), lambda b: (0, b)),
            pl.BlockSpec((n_coarse, tb), lambda b: (0, b)),
        ),
        scratch_shapes=[
            pltpu.VMEM((n_coarse, tb), jnp.float32),               # not_liq table
            pltpu.VMEM((n_coarse, tb), jnp.float32),               # staged coarse prices
        ],
        compiler_params=pltpu.CompilerParams(
            dimension_semantics=("parallel",),
            vmem_limit_bytes=vmem_limit),
    )(x_ext, x0_row, k_col, paya_col, payb_col, gcum_full,
      hedge01, apos, aneg, ccoef, vinit_arr)

    # back to the PyTorch convention (batch, n_coarse, 1); drop batch padding
    to_bt1 = lambda a: jnp.transpose(a[:, :B])[:, :, None]
    return to_bt1(v_tm), to_bt1(payoff_tm), to_bt1(cost_tm)


# -----------------------------------------------------------------------------
# Glue: deterministic TIME-MAJOR GBM simulator (stand-in for market_generator.sdeint)
# -----------------------------------------------------------------------------
def gbm_sdeint_time_major(key, ts, x0, mu, sigma):
    # returns (n_steps, B) — time-major, so the wrapper never transposes the big tensor
    B = x0.shape[0]
    dt = jnp.diff(ts)
    dW = (jax.random.normal(key, (ts.shape[0] - 1, B), dtype=jnp.float32)
          * jnp.sqrt(dt)[:, None])
    W = jnp.concatenate([jnp.zeros((1, B), jnp.float32), jnp.cumsum(dW, axis=0)], axis=0)
    paths = x0[:, 0][None, :] * jnp.exp((mu - 0.5 * sigma ** 2) * ts[:, None] + sigma * W)
    return paths.astype(jnp.float32)


# -----------------------------------------------------------------------------
# Pure-numpy reference mirroring the PyTorch forward (for verification).
# -----------------------------------------------------------------------------
def reference_forward(ts, lag, x0, paths, *, r_cD, r_bD, r_cE, r_bE,
                      theta0, theta, mean_gas_fees):
    ts = np.asarray(ts, np.float64)
    x = np.asarray(paths, np.float64)
    x0 = np.asarray(x0, np.float64)
    B = x0.shape[0]
    disc = ts[::lag]
    n_coarse = disc.shape[0]
    v_init = x0[0, 0] * (1 - theta0)
    v = np.ones((B, n_coarse, 1)) * v_init
    payoff_ = np.ones_like(v) * v_init
    cost = np.zeros_like(v)
    hedge = np.exp(r_cE * np.tile(disc.reshape(1, -1, 1), (B, 1, 1)))
    for i in range(n_coarse - 1):
        p = x[:, lag * i, :]
        p_new = x[:, lag * (i + 1), :]
        h = disc[i + 1] - disc[i]
        resid = v[:, i, :] - hedge[:, i, :] * p
        v_new = ((1 + r_cD * h) * np.clip(resid, 0, None)
                 + (1 + r_bD * h) * np.clip(resid, None, 0)
                 + (1 + r_cE * h) * np.clip(hedge[:, i, :], 0, None) * p_new
                 + (1 + r_bE * h) * np.clip(hedge[:, i, :], None, 0) * p_new)
        payoff = p_new * np.exp(r_cE * disc[i + 1]) - theta0 * x0 * np.exp(r_bD * disc[i + 1])
        t_vec = np.tile(ts[: lag * (i + 1)].reshape(1, -1, 1), (B, 1, 1))
        liq = np.any(theta * x[:, : lag * (i + 1), :] * np.exp(r_cE * t_vec)
                     <= theta0 * x0[:, None, :] * np.exp(r_bD * t_vec), axis=1)
        not_liq = (~liq).astype(np.float64)
        payoff = payoff * not_liq
        v_new = v_new * not_liq
        change = hedge[:, i, :] if i == 0 else hedge[:, i, :] - hedge[:, i - 1, :]
        txn = cost[:, i, :] + mean_gas_fees * (1 - np.exp(-10 * change ** 2))
        txn = txn * not_liq
        v[:, i + 1, :] = v_new
        payoff_[:, i + 1, :] = payoff
        cost[:, i + 1, :] = txn
    return v, payoff_, cost


if __name__ == "__main__":
    # hyperparameters of the module
    params = dict(r_cD=0.01, r_bD=0.03, r_cE=0.005, r_bE=0.07,
                  theta0=0.80, theta=0.85, mean_gas_fees=0.5)
    p0 = 1000.0
    lag = 2
    batch_size = 200                   # pads to 256 lanes -> 2 tiles of 128
    n_steps = 17                       # coarse grid length = 9

    key = jax.random.PRNGKey(0)
    ts = jnp.linspace(0.0, 1.0, n_steps, dtype=jnp.float32)
    x0 = jnp.ones((batch_size, 1), jnp.float32) * p0
    paths_tm = gbm_sdeint_time_major(key, ts, x0, mu=0.05, sigma=0.5)

    v, payoff, cost = delta_hedge_barrier_forward(ts, lag, x0, paths_tm, **params)
    jax.block_until_ready((v, payoff, cost))

    paths_bt = np.transpose(np.asarray(paths_tm))[:, :, None]      # (B, n_steps, 1)
    v_r, pay_r, cost_r = reference_forward(np.asarray(ts), lag, np.asarray(x0),
                                           paths_bt, **params)
    np.testing.assert_allclose(np.asarray(v), v_r, rtol=5e-4, atol=5e-2)
    np.testing.assert_allclose(np.asarray(payoff), pay_r, rtol=5e-4, atol=5e-2)
    np.testing.assert_allclose(np.asarray(cost), cost_r, rtol=5e-4, atol=5e-2)

    print("KERNEL_OK")
</pallas_src>

<mosaic_0001>
module attributes {stable_mosaic.version = 11 : i64} {
  func.func @_hedge_kernel(%arg0: i32, %arg1: memref<17x128xf32, #tpu.memory_space<vmem>>, %arg2: memref<1x128xf32, #tpu.memory_space<vmem>>, %arg3: memref<17x1xf32, #tpu.memory_space<vmem>>, %arg4: memref<9x1xf32, #tpu.memory_space<vmem>>, %arg5: memref<9x1xf32, #tpu.memory_space<vmem>>, %arg6: memref<9x1xf32, #tpu.memory_space<vmem>>, %arg7: memref<8xf32, #tpu.memory_space<smem>>, %arg8: memref<8xf32, #tpu.memory_space<smem>>, %arg9: memref<8xf32, #tpu.memory_space<smem>>, %arg10: memref<8xf32, #tpu.memory_space<smem>>, %arg11: memref<1xf32, #tpu.memory_space<smem>>, %arg12: memref<9x128xf32, #tpu.memory_space<vmem>>, %arg13: memref<9x128xf32, #tpu.memory_space<vmem>>, %arg14: memref<9x128xf32, #tpu.memory_space<vmem>>, %arg15: memref<9x128xf32, #tpu.memory_space<vmem>>, %arg16: memref<9x128xf32, #tpu.memory_space<vmem>>) attributes {dimension_semantics = [#tpu.dimension_semantics<parallel>], iteration_bounds = array<i64: 2>, scalar_prefetch = 0 : i64, scratch_operands = 2 : i64, tpu.core_type = #tpu.core_type<tc>, window_params = [{transform_indices = @transform_0, window_bounds = array<i64: 17, 128>}, {transform_indices = @transform_1, window_bounds = array<i64: 1, 128>}, {pipeline_mode = #tpu.pipeline_mode<synchronous>, transform_indices = @transform_2, window_bounds = array<i64: 17, 1>}, {pipeline_mode = #tpu.pipeline_mode<synchronous>, transform_indices = @transform_3, window_bounds = array<i64: 9, 1>}, {pipeline_mode = #tpu.pipeline_mode<synchronous>, transform_indices = @transform_4, window_bounds = array<i64: 9, 1>}, {pipeline_mode = #tpu.pipeline_mode<synchronous>, transform_indices = @transform_5, window_bounds = array<i64: 9, 1>}, {transform_indices = @transform_6, window_bounds = array<i64: 8>}, {transform_indices = @transform_7, window_bounds = array<i64: 8>}, {transform_indices = @transform_8, window_bounds = array<i64: 8>}, {transform_indices = @transform_9, window_bounds = array<i64: 8>}, {transform_indices = @transform_10, window_bounds = array<i64: 1>}, {transform_indices = @transform_11, window_bounds = array<i64: 9, 128>}, {transform_indices = @transform_12, window_bounds = array<i64: 9, 128>}, {transform_indices = @transform_13, window_bounds = array<i64: 9, 128>}]} {
    %c0 = arith.constant 0 : index
    %c0_0 = arith.constant 0 : index
    %0 = vector.load %arg2[%c0, %c0_0] : memref<1x128xf32, #tpu.memory_space<vmem>>, vector<1x128xf32>
    %c0_1 = arith.constant 0 : index
    %1 = memref.load %arg11[%c0_1] : memref<1xf32, #tpu.memory_space<smem>>
    %c0_2 = arith.constant 0 : index
    %c0_3 = arith.constant 0 : index
    %2 = vector.load %arg1[%c0_2, %c0_3] : memref<17x128xf32, #tpu.memory_space<vmem>>, vector<17x128xf32>
    %c0_4 = arith.constant 0 : index
    %c0_5 = arith.constant 0 : index
    %3 = vector.load %arg3[%c0_4, %c0_5] : memref<17x1xf32, #tpu.memory_space<vmem>>, vector<17x1xf32>
    %4 = vector.broadcast %0 : vector<1x128xf32> to vector<17x128xf32>
    %5 = vector.broadcast %3 : vector<17x1xf32> to vector<17x128xf32>
    %6 = arith.mulf %4, %5 : vector<17x128xf32>
    %7 = arith.cmpf ole, %2, %6 : vector<17x128xf32>
    %cst = arith.constant 1.000000e+00 : f32
    %cst_6 = arith.constant 0.000000e+00 : f32
    %8 = vector.broadcast %cst : f32 to vector<17x128xf32>
    %9 = vector.broadcast %cst_6 : f32 to vector<17x128xf32>
    %10 = arith.select %7, %8, %9 : vector<17x128xi1>, vector<17x128xf32>
    %11 = arith.truncf %10 : vector<17x128xf32> to vector<17x128xbf16>
    %12 = tpu.iota {dimensions = array<i32: 0>} : vector<9x17xi32>
    %13 = tpu.iota {dimensions = array<i32: 1>} : vector<9x17xi32>
    %c2_i32 = arith.constant 2 : i32
    %14 = vector.broadcast %c2_i32 : i32 to vector<9x17xi32>
    %15 = arith.muli %14, %12 : vector<9x17xi32>
    %16 = arith.cmpi slt, %13, %15 : vector<9x17xi32>
    %cst_7 = arith.constant 1.000000e+00 : f32
    %cst_8 = arith.constant 0.000000e+00 : f32
    %17 = vector.broadcast %cst_7 : f32 to vector<9x17xf32>
    %18 = vector.broadcast %cst_8 : f32 to vector<9x17xf32>
    %19 = arith.select %16, %17, %18 : vector<9x17xi1>, vector<9x17xf32>
    %20 = arith.truncf %19 : vector<9x17xf32> to vector<9x17xbf16>
    %cst_9 = arith.constant dense<0.000000e+00> : vector<9x128xf32>
    %21 = tpu.matmul %20, %11, %cst_9 {dimension_numbers = #tpu.dot_dimension_numbers<[1], [0], [0], [1], [0, 0, 1, 1], [], []>} : vector<9x17xbf16>, vector<17x128xbf16>, vector<9x128xf32> -> vector<9x128xf32>
    %cst_10 = arith.constant 5.000000e-01 : f32
    %22 = vector.broadcast %cst_10 : f32 to vector<9x128xf32>
    %23 = arith.cmpf ogt, %21, %22 : vector<9x128xf32>
    %cst_11 = arith.constant 0.000000e+00 : f32
    %cst_12 = arith.constant 1.000000e+00 : f32
    %24 = vector.broadcast %cst_11 : f32 to vector<9x128xf32>
    %25 = vector.broadcast %cst_12 : f32 to vector<9x128xf32>
    %26 = arith.select %23, %24, %25 : vector<9x128xi1>, vector<9x128xf32>
    %c0_13 = arith.constant 0 : index
    %c0_14 = arith.constant 0 : index
    %27 = vector.load %arg15[%c0_13, %c0_14] : memref<9x128xf32, #tpu.memory_space<vmem>>, vector<9x128xf32>
    tpu.vector_store %arg15[%c0_13, %c0_14], %26 {strides = array<i32>} : memref<9x128xf32, #tpu.memory_space<vmem>>, vector<9x128xf32>,
    %28 = vector.broadcast %1 : f32 to vector<1x128xf32>
    %c0_15 = arith.constant 0 : index
    %c0_16 = arith.constant 0 : index
    %29 = vector.load %arg12[%c0_15, %c0_16] : memref<9x128xf32, #tpu.memory_space<vmem>>, vector<1x128xf32>
    tpu.vector_store %arg12[%c0_15, %c0_16], %28 {strides = array<i32>} : memref<9x128xf32, #tpu.memory_space<vmem>>, vector<1x128xf32>,
    %c0_17 = arith.constant 0 : index
    %c0_18 = arith.constant 0 : index
    %30 = vector.load %arg1[%c0_17, %c0_18] : memref<17x128xf32, #tpu.memory_space<vmem>>, vector<1x128xf32>
    %c0_19 = arith.constant 0 : index
    %c0_20 = arith.constant 0 : index
    %31 = vector.load %arg16[%c0_19, %c0_20] : memref<9x128xf32, #tpu.memory_space<vmem>>, vector<1x128xf32>
    tpu.vector_store %arg16[%c0_19, %c0_20], %30 {strides = array<i32>} : memref<9x128xf32, #tpu.memory_space<vmem>>, vector<1x128xf32>,
    %c0_i32 = arith.constant 0 : i32
    %c1_i32 = arith.constant 1 : i32
    %32 = arith.addi %c0_i32, %c1_i32 : i32
    %c2_i32_21 = arith.constant 2 : i32
    %33 = arith.muli %32, %c2_i32_21 : i32
    %34 = arith.index_cast %33 : i32 to index
    %c0_22 = arith.constant 0 : index
    %35 = vector.load %arg1[%34, %c0_22] : memref<17x128xf32, #tpu.memory_space<vmem>>, vector<1x128xf32>
    %c1_i32_23 = arith.constant 1 : i32
    %36 = arith.addi %c0_i32, %c1_i32_23 : i32
    %37 = arith.index_cast %36 : i32 to index
    %c0_24 = arith.constant 0 : index
    %38 = vector.load %arg15[%37, %c0_24] : memref<9x128xf32, #tpu.memory_space<vmem>>, vector<1x128xf32>
    %39 = arith.index_cast %c0_i32 : i32 to index
    %40 = memref.load %arg7[%39] : memref<8xf32, #tpu.memory_space<smem>>
    %41 = vector.broadcast %40 : f32 to vector<1x128xf32>
    %42 = arith.mulf %41, %30 : vector<1x128xf32>
    %43 = arith.subf %28, %42 : vector<1x128xf32>
    %44 = arith.index_cast %c0_i32 : i32 to index
    %45 = memref.load %arg8[%44] : memref<8xf32, #tpu.memory_space<smem>>
    %cst_25 = arith.constant 0.000000e+00 : f32
    %46 = vector.broadcast %cst_25 : f32 to vector<1x128xf32>
    %47 = arith.maximumf %43, %46 : vector<1x128xf32>
    %48 = vector.broadcast %45 : f32 to vector<1x128xf32>
    %49 = arith.mulf %48, %47 : vector<1x128xf32>
    %50 = arith.index_cast %c0_i32 : i32 to index
    %51 = memref.load %arg9[%50] : memref<8xf32, #tpu.memory_space<smem>>
    %cst_26 = arith.constant 0.000000e+00 : f32
    %52 = vector.broadcast %cst_26 : f32 to vector<1x128xf32>
    %53 = arith.minimumf %43, %52 : vector<1x128xf32>
    %54 = vector.broadcast %51 : f32 to vector<1x128xf32>
    %55 = arith.mulf %54, %53 : vector<1x128xf32>
    %56 = arith.addf %49, %55 : vector<1x128xf32>
    %57 = arith.index_cast %c0_i32 : i32 to index
    %58 = memref.load %arg10[%57] : memref<8xf32, #tpu.memory_space<smem>>
    %59 = vector.broadcast %58 : f32 to vector<1x128xf32>
    %60 = arith.mulf %59, %35 : vector<1x128xf32>
    %61 = arith.addf %56, %60 : vector<1x128xf32>
    %62 = arith.mulf %61, %38 : vector<1x128xf32>
    %c1_i32_27 = arith.constant 1 : i32
    %63 = arith.addi %c0_i32, %c1_i32_27 : i32
    %64 = arith.index_cast %63 : i32 to index
    %c0_28 = arith.constant 0 : index
    %65 = vector.load %arg12[%64, %c0_28] : memref<9x128xf32, #tpu.memory_space<vmem>>, vector<1x128xf32>
    tpu.vector_store %arg12[%64, %c0_28], %62 {strides = array<i32>} : memref<9x128xf32, #tpu.memory_space<vmem>>, vector<1x128xf32>,
    %c1_i32_29 = arith.constant 1 : i32
    %66 = arith.addi %c0_i32, %c1_i32_29 : i32
    %67 = arith.index_cast %66 : i32 to index
    %c0_30 = arith.constant 0 : index
    %68 = vector.load %arg16[%67, %c0_30] : memref<9x128xf32, #tpu.memory_space<vmem>>, vector<1x128xf32>
    tpu.vector_store %arg16[%67, %c0_30], %35 {strides = array<i32>} : memref<9x128xf32, #tpu.memory_space<vmem>>, vector<1x128xf32>,
    %c1_i32_31 = arith.constant 1 : i32
    %c1_i32_32 = arith.constant 1 : i32
    %69 = arith.addi %c1_i32_31, %c1_i32_32 : i32
    %c2_i32_33 = arith.constant 2 : i32
    %70 = arith.muli %69, %c2_i32_33 : i32
    %71 = arith.index_cast %70 : i32 to index
    %c0_34 = arith.constant 0 : index
    %72 = vector.load %arg1[%71, %c0_34] : memref<17x128xf32, #tpu.memory_space<vmem>>, vector<1x128xf32>
    %c1_i32_35 = arith.constant 1 : i32
    %73 = arith.addi %c1_i32_31, %c1_i32_35 : i32
    %74 = arith.index_cast %73 : i32 to index
    %c0_36 = arith.constant 0 : index
    %75 = vector.load %arg15[%74, %c0_36] : memref<9x128xf32, #tpu.memory_space<vmem>>, vector<1x128xf32>
    %76 = arith.index_cast %c1_i32_31 : i32 to index
    %77 = memref.load %arg7[%76] : memref<8xf32, #tpu.memory_space<smem>>
    %78 = vector.broadcast %77 : f32 to vector<1x128xf32>
    %79 = arith.mulf %78, %35 : vector<1x128xf32>
    %80 = arith.subf %62, %79 : vector<1x128xf32>
    %81 = arith.index_cast %c1_i32_31 : i32 to index
    %82 = memref.load %arg8[%81] : memref<8xf32, #tpu.memory_space<smem>>
    %cst_37 = arith.constant 0.000000e+00 : f32
    %83 = vector.broadcast %cst_37 : f32 to vector<1x128xf32>
    %84 = arith.maximumf %80, %83 : vector<1x128xf32>
    %85 = vector.broadcast %82 : f32 to vector<1x128xf32>
    %86 = arith.mulf %85, %84 : vector<1x128xf32>
    %87 = arith.index_cast %c1_i32_31 : i32 to index
    %88 = memref.load %arg9[%87] : memref<8xf32, #tpu.memory_space<smem>>
    %cst_38 = arith.constant 0.000000e+00 : f32
    %89 = vector.broadcast %cst_38 : f32 to vector<1x128xf32>
    %90 = arith.minimumf %80, %89 : vector<1x128xf32>
    %91 = vector.broadcast %88 : f32 to vector<1x128xf32>
    %92 = arith.mulf %91, %90 : vector<1x128xf32>
    %93 = arith.addf %86, %92 : vector<1x128xf32>
    %94 = arith.index_cast %c1_i32_31 : i32 to index
    %95 = memref.load %arg10[%94] : memref<8xf32, #tpu.memory_space<smem>>
    %96 = vector.broadcast %95 : f32 to vector<1x128xf32>
    %97 = arith.mulf %96, %72 : vector<1x128xf32>
    %98 = arith.addf %93, %97 : vector<1x128xf32>
    %99 = arith.mulf %98, %75 : vector<1x128xf32>
    %c1_i32_39 = arith.constant 1 : i32
    %100 = arith.addi %c1_i32_31, %c1_i32_39 : i32
    %101 = arith.index_cast %100 : i32 to index
    %c0_40 = arith.constant 0 : index
    %102 = vector.load %arg12[%101, %c0_40] : memref<9x128xf32, #tpu.memory_space<vmem>>, vector<1x128xf32>
    tpu.vector_store %arg12[%101, %c0_40], %99 {strides = array<i32>} : memref<9x128xf32, #tpu.memory_space<vmem>>, vector<1x128xf32>,
    %c1_i32_41 = arith.constant 1 : i32
    %103 = arith.addi %c1_i32_31, %c1_i32_41 : i32
    %104 = arith.index_cast %103 : i32 to index
    %c0_42 = arith.constant 0 : index
    %105 = vector.load %arg16[%104, %c0_42] : memref<9x128xf32, #tpu.memory_space<vmem>>, vector<1x128xf32>
    tpu.vector_store %arg16[%104, %c0_42], %72 {strides = array<i32>} : memref<9x128xf32, #tpu.memory_space<vmem>>, vector<1x128xf32>,
    %c2_i32_43 = arith.constant 2 : i32
    %c1_i32_44 = arith.constant 1 : i32
    %106 = arith.addi %c2_i32_43, %c1_i32_44 : i32
    %c2_i32_45 = arith.constant 2 : i32
    %107 = arith.muli %106, %c2_i32_45 : i32
    %108 = arith.index_cast %107 : i32 to index
    %c0_46 = arith.constant 0 : index
    %109 = vector.load %arg1[%108, %c0_46] : memref<17x128xf32, #tpu.memory_space<vmem>>, vector<1x128xf32>
    %c1_i32_47 = arith.constant 1 : i32
    %110 = arith.addi %c2_i32_43, %c1_i32_47 : i32
    %111 = arith.index_cast %110 : i32 to index
    %c0_48 = arith.constant 0 : index
    %112 = vector.load %arg15[%111, %c0_48] : memref<9x128xf32, #tpu.memory_space<vmem>>, vector<1x128xf32>
    %113 = arith.index_cast %c2_i32_43 : i32 to index
    %114 = memref.load %arg7[%113] : memref<8xf32, #tpu.memory_space<smem>>
    %115 = vector.broadcast %114 : f32 to vector<1x128xf32>
    %116 = arith.mulf %115, %72 : vector<1x128xf32>
    %117 = arith.subf %99, %116 : vector<1x128xf32>
    %118 = arith.index_cast %c2_i32_43 : i32 to index
    %119 = memref.load %arg8[%118] : memref<8xf32, #tpu.memory_space<smem>>
    %cst_49 = arith.constant 0.000000e+00 : f32
    %120 = vector.broadcast %cst_49 : f32 to vector<1x128xf32>
    %121 = arith.maximumf %117, %120 : vector<1x128xf32>
    %122 = vector.broadcast %119 : f32 to vector<1x128xf32>
    %123 = arith.mulf %122, %121 : vector<1x128xf32>
    %124 = arith.index_cast %c2_i32_43 : i32 to index
    %125 = memref.load %arg9[%124] : memref<8xf32, #tpu.memory_space<smem>>
    %cst_50 = arith.constant 0.000000e+00 : f32
    %126 = vector.broadcast %cst_50 : f32 to vector<1x128xf32>
    %127 = arith.minimumf %117, %126 : vector<1x128xf32>
    %128 = vector.broadcast %125 : f32 to vector<1x128xf32>
    %129 = arith.mulf %128, %127 : vector<1x128xf32>
    %130 = arith.addf %123, %129 : vector<1x128xf32>
    %131 = arith.index_cast %c2_i32_43 : i32 to index
    %132 = memref.load %arg10[%131] : memref<8xf32, #tpu.memory_space<smem>>
    %133 = vector.broadcast %132 : f32 to vector<1x128xf32>
    %134 = arith.mulf %133, %109 : vector<1x128xf32>
    %135 = arith.addf %130, %134 : vector<1x128xf32>
    %136 = arith.mulf %135, %112 : vector<1x128xf32>
    %c1_i32_51 = arith.constant 1 : i32
    %137 = arith.addi %c2_i32_43, %c1_i32_51 : i32
    %138 = arith.index_cast %137 : i32 to index
    %c0_52 = arith.constant 0 : index
    %139 = vector.load %arg12[%138, %c0_52] : memref<9x128xf32, #tpu.memory_space<vmem>>, vector<1x128xf32>
    tpu.vector_store %arg12[%138, %c0_52], %136 {strides = array<i32>} : memref<9x128xf32, #tpu.memory_space<vmem>>, vector<1x128xf32>,
    %c1_i32_53 = arith.constant 1 : i32
    %140 = arith.addi %c2_i32_43, %c1_i32_53 : i32
    %141 = arith.index_cast %140 : i32 to index
    %c0_54 = arith.constant 0 : index
    %142 = vector.load %arg16[%141, %c0_54] : memref<9x128xf32, #tpu.memory_space<vmem>>, vector<1x128xf32>
    tpu.vector_store %arg16[%141, %c0_54], %109 {strides = array<i32>} : memref<9x128xf32, #tpu.memory_space<vmem>>, vector<1x128xf32>,
    %c3_i32 = arith.constant 3 : i32
    %c1_i32_55 = arith.constant 1 : i32
    %143 = arith.addi %c3_i32, %c1_i32_55 : i32
    %c2_i32_56 = arith.constant 2 : i32
    %144 = arith.muli %143, %c2_i32_56 : i32
    %145 = arith.index_cast %144 : i32 to index
    %c0_57 = arith.constant 0 : index
    %146 = vector.load %arg1[%145, %c0_57] : memref<17x128xf32, #tpu.memory_space<vmem>>, vector<1x128xf32>
    %c1_i32_58 = arith.constant 1 : i32
    %147 = arith.addi %c3_i32, %c1_i32_58 : i32
    %148 = arith.index_cast %147 : i32 to index
    %c0_59 = arith.constant 0 : index
    %149 = vector.load %arg15[%148, %c0_59] : memref<9x128xf32, #tpu.memory_space<vmem>>, vector<1x128xf32>
    %150 = arith.index_cast %c3_i32 : i32 to index
    %151 = memref.load %arg7[%150] : memref<8xf32, #tpu.memory_space<smem>>
    %152 = vector.broadcast %151 : f32 to vector<1x128xf32>
    %153 = arith.mulf %152, %109 : vector<1x128xf32>
    %154 = arith.subf %136, %153 : vector<1x128xf32>
    %155 = arith.index_cast %c3_i32 : i32 to index
    %156 = memref.load %arg8[%155] : memref<8xf32, #tpu.memory_space<smem>>
    %cst_60 = arith.constant 0.000000e+00 : f32
    %157 = vector.broadcast %cst_60 : f32 to vector<1x128xf32>
    %158 = arith.maximumf %154, %157 : vector<1x128xf32>
    %159 = vector.broadcast %156 : f32 to vector<1x128xf32>
    %160 = arith.mulf %159, %158 : vector<1x128xf32>
    %161 = arith.index_cast %c3_i32 : i32 to index
    %162 = memref.load %arg9[%161] : memref<8xf32, #tpu.memory_space<smem>>
    %cst_61 = arith.constant 0.000000e+00 : f32
    %163 = vector.broadcast %cst_61 : f32 to vector<1x128xf32>
    %164 = arith.minimumf %154, %163 : vector<1x128xf32>
    %165 = vector.broadcast %162 : f32 to vector<1x128xf32>
    %166 = arith.mulf %165, %164 : vector<1x128xf32>
    %167 = arith.addf %160, %166 : vector<1x128xf32>
    %168 = arith.index_cast %c3_i32 : i32 to index
    %169 = memref.load %arg10[%168] : memref<8xf32, #tpu.memory_space<smem>>
    %170 = vector.broadcast %169 : f32 to vector<1x128xf32>
    %171 = arith.mulf %170, %146 : vector<1x128xf32>
    %172 = arith.addf %167, %171 : vector<1x128xf32>
    %173 = arith.mulf %172, %149 : vector<1x128xf32>
    %c1_i32_62 = arith.constant 1 : i32
    %174 = arith.addi %c3_i32, %c1_i32_62 : i32
    %175 = arith.index_cast %174 : i32 to index
    %c0_63 = arith.constant 0 : index
    %176 = vector.load %arg12[%175, %c0_63] : memref<9x128xf32, #tpu.memory_space<vmem>>, vector<1x128xf32>
    tpu.vector_store %arg12[%175, %c0_63], %173 {strides = array<i32>} : memref<9x128xf32, #tpu.memory_space<vmem>>, vector<1x128xf32>,
    %c1_i32_64 = arith.constant 1 : i32
    %177 = arith.addi %c3_i32, %c1_i32_64 : i32
    %178 = arith.index_cast %177 : i32 to index
    %c0_65 = arith.constant 0 : index
    %179 = vector.load %arg16[%178, %c0_65] : memref<9x128xf32, #tpu.memory_space<vmem>>, vector<1x128xf32>
    tpu.vector_store %arg16[%178, %c0_65], %146 {strides = array<i32>} : memref<9x128xf32, #tpu.memory_space<vmem>>, vector<1x128xf32>,
    %c4_i32 = arith.constant 4 : i32
    %c1_i32_66 = arith.constant 1 : i32
    %180 = arith.addi %c4_i32, %c1_i32_66 : i32
    %c2_i32_67 = arith.constant 2 : i32
    %181 = arith.muli %180, %c2_i32_67 : i32
    %182 = arith.index_cast %181 : i32 to index
    %c0_68 = arith.constant 0 : index
    %183 = vector.load %arg1[%182, %c0_68] : memref<17x128xf32, #tpu.memory_space<vmem>>, vector<1x128xf32>
    %c1_i32_69 = arith.constant 1 : i32
    %184 = arith.addi %c4_i32, %c1_i32_69 : i32
    %185 = arith.index_cast %184 : i32 to index
    %c0_70 = arith.constant 0 : index
    %186 = vector.load %arg15[%185, %c0_70] : memref<9x128xf32, #tpu.memory_space<vmem>>, vector<1x128xf32>
    %187 = arith.index_cast %c4_i32 : i32 to index
    %188 = memref.load %arg7[%187] : memref<8xf32, #tpu.memory_space<smem>>
    %189 = vector.broadcast %188 : f32 to vector<1x128xf32>
    %190 = arith.mulf %189, %146 : vector<1x128xf32>
    %191 = arith.subf %173, %190 : vector<1x128xf32>
    %192 = arith.index_cast %c4_i32 : i32 to index
    %193 = memref.load %arg8[%192] : memref<8xf32, #tpu.memory_space<smem>>
    %cst_71 = arith.constant 0.000000e+00 : f32
    %194 = vector.broadcast %cst_71 : f32 to vector<1x128xf32>
    %195 = arith.maximumf %191, %194 : vector<1x128xf32>
    %196 = vector.broadcast %193 : f32 to vector<1x128xf32>
    %197 = arith.mulf %196, %195 : vector<1x128xf32>
    %198 = arith.index_cast %c4_i32 : i32 to index
    %199 = memref.load %arg9[%198] : memref<8xf32, #tpu.memory_space<smem>>
    %cst_72 = arith.constant 0.000000e+00 : f32
    %200 = vector.broadcast %cst_72 : f32 to vector<1x128xf32>
    %201 = arith.minimumf %191, %200 : vector<1x128xf32>
    %202 = vector.broadcast %199 : f32 to vector<1x128xf32>
    %203 = arith.mulf %202, %201 : vector<1x128xf32>
    %204 = arith.addf %197, %203 : vector<1x128xf32>
    %205 = arith.index_cast %c4_i32 : i32 to index
    %206 = memref.load %arg10[%205] : memref<8xf32, #tpu.memory_space<smem>>
    %207 = vector.broadcast %206 : f32 to vector<1x128xf32>
    %208 = arith.mulf %207, %183 : vector<1x128xf32>
    %209 = arith.addf %204, %208 : vector<1x128xf32>
    %210 = arith.mulf %209, %186 : vector<1x128xf32>
    %c1_i32_73 = arith.constant 1 : i32
    %211 = arith.addi %c4_i32, %c1_i32_73 : i32
    %212 = arith.index_cast %211 : i32 to index
    %c0_74 = arith.constant 0 : index
    %213 = vector.load %arg12[%212, %c0_74] : memref<9x128xf32, #tpu.memory_space<vmem>>, vector<1x128xf32>
    tpu.vector_store %arg12[%212, %c0_74], %210 {strides = array<i32>} : memref<9x128xf32, #tpu.memory_space<vmem>>, vector<1x128xf32>,
    %c1_i32_75 = arith.constant 1 : i32
    %214 = arith.addi %c4_i32, %c1_i32_75 : i32
    %215 = arith.index_cast %214 : i32 to index
    %c0_76 = arith.constant 0 : index
    %216 = vector.load %arg16[%215, %c0_76] : memref<9x128xf32, #tpu.memory_space<vmem>>, vector<1x128xf32>
    tpu.vector_store %arg16[%215, %c0_76], %183 {strides = array<i32>} : memref<9x128xf32, #tpu.memory_space<vmem>>, vector<1x128xf32>,
    %c5_i32 = arith.constant 5 : i32
    %c1_i32_77 = arith.constant 1 : i32
    %217 = arith.addi %c5_i32, %c1_i32_77 : i32
    %c2_i32_78 = arith.constant 2 : i32
    %218 = arith.muli %217, %c2_i32_78 : i32
    %219 = arith.index_cast %218 : i32 to index
    %c0_79 = arith.constant 0 : index
    %220 = vector.load %arg1[%219, %c0_79] : memref<17x128xf32, #tpu.memory_space<vmem>>, vector<1x128xf32>
    %c1_i32_80 = arith.constant 1 : i32
    %221 = arith.addi %c5_i32, %c1_i32_80 : i32
    %222 = arith.index_cast %221 : i32 to index
    %c0_81 = arith.constant 0 : index
    %223 = vector.load %arg15[%222, %c0_81] : memref<9x128xf32, #tpu.memory_space<vmem>>, vector<1x128xf32>
    %224 = arith.index_cast %c5_i32 : i32 to index
    %225 = memref.load %arg7[%224] : memref<8xf32, #tpu.memory_space<smem>>
    %226 = vector.broadcast %225 : f32 to vector<1x128xf32>
    %227 = arith.mulf %226, %183 : vector<1x128xf32>
    %228 = arith.subf %210, %227 : vector<1x128xf32>
    %229 = arith.index_cast %c5_i32 : i32 to index
    %230 = memref.load %arg8[%229] : memref<8xf32, #tpu.memory_space<smem>>
    %cst_82 = arith.constant 0.000000e+00 : f32
    %231 = vector.broadcast %cst_82 : f32 to vector<1x128xf32>
    %232 = arith.maximumf %228, %231 : vector<1x128xf32>
    %233 = vector.broadcast %230 : f32 to vector<1x128xf32>
    %234 = arith.mulf %233, %232 : vector<1x128xf32>
    %235 = arith.index_cast %c5_i32 : i32 to index
    %236 = memref.load %arg9[%235] : memref<8xf32, #tpu.memory_space<smem>>
    %cst_83 = arith.constant 0.000000e+00 : f32
    %237 = vector.broadcast %cst_83 : f32 to vector<1x128xf32>
    %238 = arith.minimumf %228, %237 : vector<1x128xf32>
    %239 = vector.broadcast %236 : f32 to vector<1x128xf32>
    %240 = arith.mulf %239, %238 : vector<1x128xf32>
    %241 = arith.addf %234, %240 : vector<1x128xf32>
    %242 = arith.index_cast %c5_i32 : i32 to index
    %243 = memref.load %arg10[%242] : memref<8xf32, #tpu.memory_space<smem>>
    %244 = vector.broadcast %243 : f32 to vector<1x128xf32>
    %245 = arith.mulf %244, %220 : vector<1x128xf32>
    %246 = arith.addf %241, %245 : vector<1x128xf32>
    %247 = arith.mulf %246, %223 : vector<1x128xf32>
    %c1_i32_84 = arith.constant 1 : i32
    %248 = arith.addi %c5_i32, %c1_i32_84 : i32
    %249 = arith.index_cast %248 : i32 to index
    %c0_85 = arith.constant 0 : index
    %250 = vector.load %arg12[%249, %c0_85] : memref<9x128xf32, #tpu.memory_space<vmem>>, vector<1x128xf32>
    tpu.vector_store %arg12[%249, %c0_85], %247 {strides = array<i32>} : memref<9x128xf32, #tpu.memory_space<vmem>>, vector<1x128xf32>,
    %c1_i32_86 = arith.constant 1 : i32
    %251 = arith.addi %c5_i32, %c1_i32_86 : i32
    %252 = arith.index_cast %251 : i32 to index
    %c0_87 = arith.constant 0 : index
    %253 = vector.load %arg16[%252, %c0_87] : memref<9x128xf32, #tpu.memory_space<vmem>>, vector<1x128xf32>
    tpu.vector_store %arg16[%252, %c0_87], %220 {strides = array<i32>} : memref<9x128xf32, #tpu.memory_space<vmem>>, vector<1x128xf32>,
    %c6_i32 = arith.constant 6 : i32
    %c1_i32_88 = arith.constant 1 : i32
    %254 = arith.addi %c6_i32, %c1_i32_88 : i32
    %c2_i32_89 = arith.constant 2 : i32
    %255 = arith.muli %254, %c2_i32_89 : i32
    %256 = arith.index_cast %255 : i32 to index
    %c0_90 = arith.constant 0 : index
    %257 = vector.load %arg1[%256, %c0_90] : memref<17x128xf32, #tpu.memory_space<vmem>>, vector<1x128xf32>
    %c1_i32_91 = arith.constant 1 : i32
    %258 = arith.addi %c6_i32, %c1_i32_91 : i32
    %259 = arith.index_cast %258 : i32 to index
    %c0_92 = arith.constant 0 : index
    %260 = vector.load %arg15[%259, %c0_92] : memref<9x128xf32, #tpu.memory_space<vmem>>, vector<1x128xf32>
    %261 = arith.index_cast %c6_i32 : i32 to index
    %262 = memref.load %arg7[%261] : memref<8xf32, #tpu.memory_space<smem>>
    %263 = vector.broadcast %262 : f32 to vector<1x128xf32>
    %264 = arith.mulf %263, %220 : vector<1x128xf32>
    %265 = arith.subf %247, %264 : vector<1x128xf32>
    %266 = arith.index_cast %c6_i32 : i32 to index
    %267 = memref.load %arg8[%266] : memref<8xf32, #tpu.memory_space<smem>>
    %cst_93 = arith.constant 0.000000e+00 : f32
    %268 = vector.broadcast %cst_93 : f32 to vector<1x128xf32>
    %269 = arith.maximumf %265, %268 : vector<1x128xf32>
    %270 = vector.broadcast %267 : f32 to vector<1x128xf32>
    %271 = arith.mulf %270, %269 : vector<1x128xf32>
    %272 = arith.index_cast %c6_i32 : i32 to index
    %273 = memref.load %arg9[%272] : memref<8xf32, #tpu.memory_space<smem>>
    %cst_94 = arith.constant 0.000000e+00 : f32
    %274 = vector.broadcast %cst_94 : f32 to vector<1x128xf32>
    %275 = arith.minimumf %265, %274 : vector<1x128xf32>
    %276 = vector.broadcast %273 : f32 to vector<1x128xf32>
    %277 = arith.mulf %276, %275 : vector<1x128xf32>
    %278 = arith.addf %271, %277 : vector<1x128xf32>
    %279 = arith.index_cast %c6_i32 : i32 to index
    %280 = memref.load %arg10[%279] : memref<8xf32, #tpu.memory_space<smem>>
    %281 = vector.broadcast %280 : f32 to vector<1x128xf32>
    %282 = arith.mulf %281, %257 : vector<1x128xf32>
    %283 = arith.addf %278, %282 : vector<1x128xf32>
    %284 = arith.mulf %283, %260 : vector<1x128xf32>
    %c1_i32_95 = arith.constant 1 : i32
    %285 = arith.addi %c6_i32, %c1_i32_95 : i32
    %286 = arith.index_cast %285 : i32 to index
    %c0_96 = arith.constant 0 : index
    %287 = vector.load %arg12[%286, %c0_96] : memref<9x128xf32, #tpu.memory_space<vmem>>, vector<1x128xf32>
    tpu.vector_store %arg12[%286, %c0_96], %284 {strides = array<i32>} : memref<9x128xf32, #tpu.memory_space<vmem>>, vector<1x128xf32>,
    %c1_i32_97 = arith.constant 1 : i32
    %288 = arith.addi %c6_i32, %c1_i32_97 : i32
    %289 = arith.index_cast %288 : i32 to index
    %c0_98 = arith.constant 0 : index
    %290 = vector.load %arg16[%289, %c0_98] : memref<9x128xf32, #tpu.memory_space<vmem>>, vector<1x128xf32>
    tpu.vector_store %arg16[%289, %c0_98], %257 {strides = array<i32>} : memref<9x128xf32, #tpu.memory_space<vmem>>, vector<1x128xf32>,
    %c7_i32 = arith.constant 7 : i32
    %c1_i32_99 = arith.constant 1 : i32
    %291 = arith.addi %c7_i32, %c1_i32_99 : i32
    %c2_i32_100 = arith.constant 2 : i32
    %292 = arith.muli %291, %c2_i32_100 : i32
    %293 = arith.index_cast %292 : i32 to index
    %c0_101 = arith.constant 0 : index
    %294 = vector.load %arg1[%293, %c0_101] : memref<17x128xf32, #tpu.memory_space<vmem>>, vector<1x128xf32>
    %c1_i32_102 = arith.constant 1 : i32
    %295 = arith.addi %c7_i32, %c1_i32_102 : i32
    %296 = arith.index_cast %295 : i32 to index
    %c0_103 = arith.constant 0 : index
    %297 = vector.load %arg15[%296, %c0_103] : memref<9x128xf32, #tpu.memory_space<vmem>>, vector<1x128xf32>
    %298 = arith.index_cast %c7_i32 : i32 to index
    %299 = memref.load %arg7[%298] : memref<8xf32, #tpu.memory_space<smem>>
    %300 = vector.broadcast %299 : f32 to vector<1x128xf32>
    %301 = arith.mulf %300, %257 : vector<1x128xf32>
    %302 = arith.subf %284, %301 : vector<1x128xf32>
    %303 = arith.index_cast %c7_i32 : i32 to index
    %304 = memref.load %arg8[%303] : memref<8xf32, #tpu.memory_space<smem>>
    %cst_104 = arith.constant 0.000000e+00 : f32
    %305 = vector.broadcast %cst_104 : f32 to vector<1x128xf32>
    %306 = arith.maximumf %302, %305 : vector<1x128xf32>
    %307 = vector.broadcast %304 : f32 to vector<1x128xf32>
    %308 = arith.mulf %307, %306 : vector<1x128xf32>
    %309 = arith.index_cast %c7_i32 : i32 to index
    %310 = memref.load %arg9[%309] : memref<8xf32, #tpu.memory_space<smem>>
    %cst_105 = arith.constant 0.000000e+00 : f32
    %311 = vector.broadcast %cst_105 : f32 to vector<1x128xf32>
    %312 = arith.minimumf %302, %311 : vector<1x128xf32>
    %313 = vector.broadcast %310 : f32 to vector<1x128xf32>
    %314 = arith.mulf %313, %312 : vector<1x128xf32>
    %315 = arith.addf %308, %314 : vector<1x128xf32>
    %316 = arith.index_cast %c7_i32 : i32 to index
    %317 = memref.load %arg10[%316] : memref<8xf32, #tpu.memory_space<smem>>
    %318 = vector.broadcast %317 : f32 to vector<1x128xf32>
    %319 = arith.mulf %318, %294 : vector<1x128xf32>
    %320 = arith.addf %315, %319 : vector<1x128xf32>
    %321 = arith.mulf %320, %297 : vector<1x128xf32>
    %c1_i32_106 = arith.constant 1 : i32
    %322 = arith.addi %c7_i32, %c1_i32_106 : i32
    %323 = arith.index_cast %322 : i32 to index
    %c0_107 = arith.constant 0 : index
    %324 = vector.load %arg12[%323, %c0_107] : memref<9x128xf32, #tpu.memory_space<vmem>>, vector<1x128xf32>
    tpu.vector_store %arg12[%323, %c0_107], %321 {strides = array<i32>} : memref<9x128xf32, #tpu.memory_space<vmem>>, vector<1x128xf32>,
    %c1_i32_108 = arith.constant 1 : i32
    %325 = arith.addi %c7_i32, %c1_i32_108 : i32
    %326 = arith.index_cast %325 : i32 to index
    %c0_109 = arith.constant 0 : index
    %327 = vector.load %arg16[%326, %c0_109] : memref<9x128xf32, #tpu.memory_space<vmem>>, vector<1x128xf32>
    tpu.vector_store %arg16[%326, %c0_109], %294 {strides = array<i32>} : memref<9x128xf32, #tpu.memory_space<vmem>>, vector<1x128xf32>,
    %c8_i32 = arith.constant 8 : i32
    %328 = tpu.iota {dimensions = array<i32: 0>} : vector<9x128xi32>
    %c0_i32_110 = arith.constant 0 : i32
    %329 = vector.broadcast %c0_i32_110 : i32 to vector<9x128xi32>
    %330 = arith.cmpi eq, %328, %329 : vector<9x128xi32>
    %c0_111 = arith.constant 0 : index
    %c0_112 = arith.constant 0 : index
    %331 = vector.load %arg15[%c0_111, %c0_112] : memref<9x128xf32, #tpu.memory_space<vmem>>, vector<9x128xf32>
    %c0_113 = arith.constant 0 : index
    %c0_114 = arith.constant 0 : index
    %332 = vector.load %arg16[%c0_113, %c0_114] : memref<9x128xf32, #tpu.memory_space<vmem>>, vector<9x128xf32>
    %c0_115 = arith.constant 0 : index
    %c0_116 = arith.constant 0 : index
    %333 = vector.load %arg4[%c0_115, %c0_116] : memref<9x1xf32, #tpu.memory_space<vmem>>, vector<9x1xf32>
    %334 = vector.broadcast %333 : vector<9x1xf32> to vector<9x128xf32>
    %335 = arith.mulf %332, %334 : vector<9x128xf32>
    %c0_117 = arith.constant 0 : index
    %c0_118 = arith.constant 0 : index
    %336 = vector.load %arg5[%c0_117, %c0_118] : memref<9x1xf32, #tpu.memory_space<vmem>>, vector<9x1xf32>
    %337 = vector.broadcast %0 : vector<1x128xf32> to vector<9x128xf32>
    %338 = vector.broadcast %336 : vector<9x1xf32> to vector<9x128xf32>
    %339 = arith.mulf %337, %338 : vector<9x128xf32>
    %340 = arith.subf %335, %339 : vector<9x128xf32>
    %341 = arith.mulf %331, %340 : vector<9x128xf32>
    %342 = vector.broadcast %1 : f32 to vector<9x128xf32>
    %343 = arith.select %330, %342, %341 : vector<9x128xi1>, vector<9x128xf32>
    %c0_119 = arith.constant 0 : index
    %c0_120 = arith.constant 0 : index
    %344 = vector.load %arg13[%c0_119, %c0_120] : memref<9x128xf32, #tpu.memory_space<vmem>>, vector<9x128xf32>
    tpu.vector_store %arg13[%c0_119, %c0_120], %343 {strides = array<i32>} : memref<9x128xf32, #tpu.memory_space<vmem>>, vector<9x128xf32>,
    %c0_121 = arith.constant 0 : index
    %c0_122 = arith.constant 0 : index
    %345 = vector.load %arg6[%c0_121, %c0_122] : memref<9x1xf32, #tpu.memory_space<vmem>>, vector<9x1xf32>
    %346 = vector.broadcast %345 : vector<9x1xf32> to vector<9x128xf32>
    %347 = arith.mulf %331, %346 : vector<9x128xf32>
    %cst_123 = arith.constant 0.000000e+00 : f32
    %348 = vector.broadcast %cst_123 : f32 to vector<9x128xf32>
    %349 = arith.select %330, %348, %347 : vector<9x128xi1>, vector<9x128xf32>
    %c0_124 = arith.constant 0 : index
    %c0_125 = arith.constant 0 : index
    %350 = vector.load %arg14[%c0_124, %c0_125] : memref<9x128xf32, #tpu.memory_space<vmem>>, vector<9x128xf32>
    tpu.vector_store %arg14[%c0_124, %c0_125], %349 {strides = array<i32>} : memref<9x128xf32, #tpu.memory_space<vmem>>, vector<9x128xf32>,
    return
  }
  func.func @transform_0(%arg0: i32) -> (i32, i32) {
    %c0_i32 = arith.constant 0 : i32
    %c0_i32_0 = arith.constant 0 : i32
    return %c0_i32, %arg0 : i32, i32
  }
  func.func @transform_1(%arg0: i32) -> (i32, i32) {
    %c0_i32 = arith.constant 0 : i32
    %c0_i32_0 = arith.constant 0 : i32
    return %c0_i32, %arg0 : i32, i32
  }
  func.func @transform_2(%arg0: i32) -> (i32, i32) {
    %c0_i32 = arith.constant 0 : i32
    %c0_i32_0 = arith.constant 0 : i32
    %c0_i32_1 = arith.constant 0 : i32
    return %c0_i32, %c0_i32_0 : i32, i32
  }
  func.func @transform_3(%arg0: i32) -> (i32, i32) {
    %c0_i32 = arith.constant 0 : i32
    %c0_i32_0 = arith.constant 0 : i32
    %c0_i32_1 = arith.constant 0 : i32
    return %c0_i32, %c0_i32_0 : i32, i32
  }
  func.func @transform_4(%arg0: i32) -> (i32, i32) {
    %c0_i32 = arith.constant 0 : i32
    %c0_i32_0 = arith.constant 0 : i32
    %c0_i32_1 = arith.constant 0 : i32
    return %c0_i32, %c0_i32_0 : i32, i32
  }
  func.func @transform_5(%arg0: i32) -> (i32, i32) {
    %c0_i32 = arith.constant 0 : i32
    %c0_i32_0 = arith.constant 0 : i32
    %c0_i32_1 = arith.constant 0 : i32
    return %c0_i32, %c0_i32_0 : i32, i32
  }
  func.func @transform_6(%arg0: i32) -> i32 {
    %c0_i32 = arith.constant 0 : i32
    %c0_i32_0 = arith.constant 0 : i32
    return %c0_i32 : i32
  }
  func.func @transform_7(%arg0: i32) -> i32 {
    %c0_i32 = arith.constant 0 : i32
    %c0_i32_0 = arith.constant 0 : i32
    return %c0_i32 : i32
  }
  func.func @transform_8(%arg0: i32) -> i32 {
    %c0_i32 = arith.constant 0 : i32
    %c0_i32_0 = arith.constant 0 : i32
    return %c0_i32 : i32
  }
  func.func @transform_9(%arg0: i32) -> i32 {
    %c0_i32 = arith.constant 0 : i32
    %c0_i32_0 = arith.constant 0 : i32
    return %c0_i32 : i32
  }
  func.func @transform_10(%arg0: i32) -> i32 {
    %c0_i32 = arith.constant 0 : i32
    %c0_i32_0 = arith.constant 0 : i32
    return %c0_i32 : i32
  }
  func.func @transform_11(%arg0: i32) -> (i32, i32) {
    %c0_i32 = arith.constant 0 : i32
    %c0_i32_0 = arith.constant 0 : i32
    return %c0_i32, %arg0 : i32, i32
  }
  func.func @transform_12(%arg0: i32) -> (i32, i32) {
    %c0_i32 = arith.constant 0 : i32
    %c0_i32_0 = arith.constant 0 : i32
    return %c0_i32, %arg0 : i32, i32
  }
  func.func @transform_13(%arg0: i32) -> (i32, i32) {
    %c0_i32 = arith.constant 0 : i32
    %c0_i32_0 = arith.constant 0 : i32
    return %c0_i32, %arg0 : i32, i32
  }
}

</mosaic_0001>

<bundles_post_ra>
// kernel: tpu_custom_call.1
= control target key start
LH: loop header
LB: loop body
LE: loop exit
PB: predicated region body
PF: predicated region fallthrough
CT: control target
= control target key end

     0   :  { %s1978_s0 = inlined_call_operand.hbm [shape: f32[17,256], index: 0, kind: input, shape index: {}]   ;;  %s1979_s1 = inlined_call_operand.vmem [shape: f32[1,256], index: 1, kind: input, shape index: {}]   ;;  %s1980_s2 = inlined_call_operand.vmem [shape: f32[17,1], index: 2, kind: input, shape index: {}]   ;;  %s1981_s3 = inlined_call_operand.vmem [shape: f32[9,1], index: 3, kind: input, shape index: {}]   ;;  %s1982_s4 = inlined_call_operand.vmem [shape: f32[9,1], index: 4, kind: input, shape index: {}]   ;;  %s1983_s5 = inlined_call_operand.vmem [shape: f32[9,1], index: 5, kind: input, shape index: {}]   ;;  %s1984_s6 = inlined_call_operand.vmem [shape: f32[8], index: 6, kind: input, shape index: {}]   ;;  %s1985_s7 = inlined_call_operand.vmem [shape: f32[8], index: 7, kind: input, shape index: {}]   ;;  %s1986_s8 = inlined_call_operand.vmem [shape: f32[8], index: 8, kind: input, shape index: {}]   ;;  %s1987_s9 = inlined_call_operand.vmem [shape: f32[8], index: 9, kind: input, shape index: {}]   ;;  %s1988_s10 = inlined_call_operand.<no memory space> [shape: f32[1], index: 10, kind: input, shape index: {}]   ;;  %s1989_s11 = inlined_call_operand.hbm [shape: f32[9,256], index: 11, kind: output, shape index: {0}]   ;;  %s1990_s12 = inlined_call_operand.hbm [shape: f32[9,256], index: 12, kind: output, shape index: {1}]   ;;  %s1991_s13 = inlined_call_operand.hbm [shape: f32[9,256], index: 13, kind: output, shape index: {2}]  }
   0x1   :  { %1998 = sst [smem:[#allocation29_spill]] %s1978_s0 }
   0x2   :  { %1999 = sst [smem:[#allocation30_spill]] %s1979_s1 }
   0x3   :  { %2000 = sst [smem:[#allocation31_spill]] %s1980_s2 }
   0x4   :  { %2001 = sst [smem:[#allocation32_spill]] %s1981_s3 }
   0x5   :  { %2002 = sst [smem:[#allocation33_spill]] %s1984_s6 }
   0x6   :  { %2003 = sst [smem:[#allocation34_spill]] %s1985_s7 }
   0x7   :  { %2004 = sst [smem:[#allocation35_spill]] %s1986_s8 }
   0x8   :  { %2005 = sst [smem:[#allocation36_spill]] %s1987_s9 }
   0x9   :  { %19 = sst [smem:[#allocation4]] %s1988_s10 }
   0xa   :  { %20 = vsyncpa [#allocation6], 0 }
   0xb   :  { %22 = vsyncpa [#allocation6 + $0x1], 0 }
   0xc   :  { %23 = vsyncpa [#allocation8], 0 }
   0xd   :  { %24 = vsyncpa [#allocation11], 0 }
   0xe   :  { %25 = vsyncpa [#allocation14], 0 }
   0xf   :  { %26 = vsyncpa [#allocation7], 0 }
  0x10   :  { %28 = vsyncpa [#allocation7 + $0x1], 0 }
  0x11   :  { %29 = vsyncpa [#allocation17], 0 }
  0x12   :  { %31 = vsyncpa [#allocation17 + $0x1], 0  ;;  %s1593_s27 = smov 0   ;;  %s1595_s28 = smov 0  }
  0x13   :  { %s1597_s29 = smov 0   ;;  %s1599_s30 = smov 0  }
  0x14 LB: > { %2006 = sst [smem:[#allocation25_spill]] %s1500_s29  ;;  %s1614_s10 = sadd.s32 4294967295, %s1504_s30   ;;  %s1504_s30 = sphi %s1599_s30, %s2026_s30   ;;  %s1500_s29 = sphi %s1597_s29, %s2028_s29   ;;  %s1496_s28 = sphi %s1595_s28, %s2030_s28   ;;  %s1492_s27 = sphi %s1593_s27, %s2029_s27  }
  0x15   : > { %2007 = sst [smem:[#allocation26_spill]] %s1504_s30  ;;  %s1992_s14 = sadd.s32 4294967294, %s1504_s30  }
  0x16   : > { %p57_p0 = scmp.ne.s32.totalorder %s1496_s28, %s1492_s27  ;;  %p58_p1 = scmp.eq.s32.totalorder %s1614_s10, 0 }
  0x17   : > { %p296_p2 = scmp.eq.s32.totalorder %s1614_s10, 1  ;;  %p302_p3 = scmp.eq.s32.totalorder %s1992_s14, 1 }
  0x18   : > { %p1625_p4 = por %p58_p1, %p57_p0  ;;  %p1109_p5 = scmp.ge.s32.totalorder %s1504_s30, 1 }
  0x19   : > { %p1630_p6 = por %p302_p3, %p57_p0  ;;  %p361_p7 = scmp.lt.s32.totalorder %s1504_s30, 3 }
  0x1a   : > { %s2010_s7 = sld [smem:[#allocation34_spill]]  ;;  %s1506_s21 = smov [#allocation10]  }
  0x1b   : > { %p1638_p8 = pnand %p1109_p5, %p361_p7  ;;  %s2012_s6 = sld [smem:[#allocation33_spill]] }
  0x1c   : > { %s2013_s8 = sld [smem:[#allocation35_spill]]  ;;  %s1507_s22 = smov [#allocation9]  }
  0x1d   : > { %p1189_p10 = pneg %p1638_p8  ;;  %s2014_s9 = sld [smem:[#allocation36_spill]] }
  0x1e   : > { %s1509_s24 = smov [#allocation13]   ;;  %s1657_s25 = sadd.s32 1, %s1504_s30  }
  0x1f   : > { %p1190_p11 = pnand %p1189_p10, %p58_p1  ;;  %2015 = sst [smem:[#allocation27_spill]] %s1657_s25 }
  0x20   : > { %s395_s19 = sshll.u32 %s2010_s7, 4  ;;  %s41_s17 = ssub.s32 %s1504_s30, %s1657_s25  ;;  %s396_s19 = int_to_ptr.vmem [resolvable:$true] %s395_s19 }
  0x21   : > { %s385_s23 = sshll.u32 %s2012_s6, 4  ;;  %s1508_s6 = smov [#allocation12]   ;;  %s386_s23 = int_to_ptr.vmem [resolvable:$true] %s385_s23 }
  0x22   : > { %s405_s26 = sshll.u32 %s2013_s8, 4  ;;  %p42_p12 = scmp.eq.s32.totalorder %s41_s17, 0  ;;  %s406_s26 = int_to_ptr.vmem [resolvable:$true] %s405_s26 }
  0x23   : > { %s415_s14 = sshll.u32 %s2014_s9, 4  ;;  %s44_s18 = sadd.s32 1, %s1500_s29  ;;  %s416_s14 = int_to_ptr.vmem [resolvable:$true] %s415_s14 }
  0x24   : > { %1195 = dma.vmem_to_smem (!%p1190_p11), %s396_s19, 16, %s1506_s21, [#allocation11]  }
  0x25   : > { %1192 = dma.vmem_to_smem (!%p1190_p11), %s386_s23, 16, %s1507_s22, [#allocation8]  }
  0x26   : > { %1198 = dma.vmem_to_smem (!%p1190_p11), %s406_s26, 16, %s1508_s6, [#allocation11]  }
  0x27   : > { %1201 = dma.vmem_to_smem (!%p1190_p11), %s416_s14, 16, %s1509_s24, [#allocation14]  }
  0x28   : > { %p51_p13 = scmp.ne.s32.totalorder %s1500_s29, %s1496_s28  ;;  %p52_p0 = scmp.eq.s32.totalorder %s1504_s30, 0 }
  0x29   : > { %s1666_s19 = scalar_select %p42_p12, %s1500_s29, %s44_s18  }
  0x2a   : > { %p53_p3 = por %p52_p0, %p51_p13  ;;  %p1670_p5 = por %p296_p2, %p51_p13 }
  0x2b   : > { %2016 = sst [smem:[#allocation28_spill]] %s1666_s19  ;;  %p1220_p7 = scmp.lt.s32.totalorder %s1504_s30, 2 }
  0x2c   : > { %s429_s6 = sand.u32 1, %s1500_s29   ;;  %s1115_s14 = sshll.u32 %s1504_s30, 3 }
  0x2d   : > { %s1163_s26 = smul.u32 24, %s429_s6  ;;  %p1677_p10 = pnand %p1220_p7, %p53_p3 }
  0x2e   : > { %s2019_s0 = sld [smem:[#allocation29_spill]]  ;;  %s430_s9 = scalar_lea.sflag [#allocation6], %s429_s6 }
  0x2f   : > { %s433_s7 = scalar_lea.vmem [#allocation5], %s1163_s26  ;;  %p1340_p11 = pneg %p1677_p10 }
  0x30   : > { %s440_s8 = sshll.u32 %s433_s7, 4  ;;  %s441_s8 = int_to_ptr.vmem [resolvable:$true] %s440_s8 }
  0x34   : > { %s437_s17 = scalar_lea.hbm %s2019_s0, %s1115_s14  ;;  %s1343_s22 = scalar_lea.hbm %s2019_s0, 48 }
  0x35   : > { %s438_s18 = sshll.u32 %s437_s17, 4  ;;  %s439_s18 = int_to_ptr.hbm [resolvable:$true] %s438_s18 }
  0x36   : > { %s1336_s19 = sshra.s32 %s439_s18, 4  ;;  %s1337_s19 = int_to_ptr.hbm [resolvable:$true] %s1336_s19 }
  0x37   : > { %s1338_s29 = scalar_lea.hbm %s1337_s19, 24  ;;  %p1344_p0 = scmp.lt.s32.totalorder %s1337_s19, %s2019_s0 }
  0x38   : > { %p1339_p2 = scmp.ne.s32.totalorder %s1337_s19, %s1338_s29  ;;  %p1345_p3 = scmp.lt.s32.totalorder %s1343_s22, %s1338_s29 }
  0x3a   : > { %p1341_p12 = pnand %p1340_p11, %p1339_p2  ;;  %p1346_p7 = por %p1345_p3, %p1344_p0 }
  0x3c   : > { %p1342_p13 = pneg %p1341_p12 }
  0x3e   : > { %p1347_p9 = pnand %p1346_p7, %p1342_p13 }
  0x40   : > { %1350 = shalt.err (!%p1347_p9)
}
  0x41   : > { %s1510_s7 = smov 256   ;;  %s1511_s6 = smov 128  }
  0x42   : > { %s1512_s26 = smov 8   ;;  %458 = sbr.rel (%p1638_p8) target bundleno = 456 (0x1c8), region = 64 }
  0x43   : > { %1205 = dma.hbm_to_vmem [thread:$0]  (!%p1677_p10), %s439_s18, 384, %s441_s8, %s430_s9, %s1510_s7, %s1511_s6, %s1512_s26  }
  0x44   : > { %s1697_s30 = sand.u32 (!%p1638_p8), 1, %s1496_s28  }
  0x45   : > { %s1164_s25 = smul.u32 (!%p1638_p8), 24, %s1697_s30  ;;  %s461_s29 = scalar_lea.sflag (!%p1638_p8), [#allocation6], %s1697_s30 }
  0x47   : > { %s1701_s19 = scalar_lea.vmem [#allocation5], %s1164_s25 }
  0x48   : > { %1467 = dma.done.wait (%p1625_p4), %s461_s29, 384  }
  0x49   : > { %1469 = vsyncadd (%p1625_p4), %s461_s29, 4294966912 }
  0x4a   : > { %1471 = dma.done.wait (%p58_p1), [#allocation8], 16  }
  0x4b   : > { %1473 = vsyncadd (%p58_p1), [#allocation8], 4294967280 }
  0x4c   : > { %1475 = dma.done.wait (%p58_p1), [#allocation11], 32  }
  0x4d   : > { %1477 = vsyncadd (%p58_p1), [#allocation11], 4294967264 }
  0x4e   : > { %1479 = dma.done.wait (%p58_p1), [#allocation14], 16  }
  0x4f   : > { %1481 = vsyncadd (%p58_p1), [#allocation14], 4294967280 }
  0x50   : > { %490 = sfence }
  0x51   : > { %s2020_s2 = sld [smem:[#allocation31_spill]]  ;;  %p542_p4 = scmp.lt.s32.totalorder %s1614_s10, 1  ;;  %v1513_v2 = vmov 0   ;;  %v825_v3 = vld [vmem:[%s1982_s4] sm:$0xff]  ;;  %v826_v8 = vld [vmem:[%s1982_s4 + $0x8] sm:$0x1]  ;;  %v583_v19 = vlaneseq }
  0x52   : > { %1273 = vset.pattern.permute.xlu1 %v1513_v2  ;;  %1272 = vset.pattern.permute.xlu0 %v1513_v2  ;;  %s2021_s1 = sld [smem:[#allocation30_spill]]  ;;  %v847_v7 = vld [vmem:[%s1983_s5] sm:$0xff]  ;;  %v1784_v17 = vld [vmem:[%s1701_s19 + $0x10] sm:$0x1]  ;;  %vm599_vm0 = vcmask 1040384   ;;  %v1514_v30 = vmov 0.0  }
  0x53   : > { %s1730_s18 = scalar_select %p542_p4, %s1614_s10, 1  ;;  %1274 = vset.pattern.permute.xlu2 %v1513_v2  ;;  %v1752_v9 = vld [vmem:[%s1701_s19] sm:$0x1]  ;;  %v1755_v10 = vld [vmem:[%s1701_s19 + $0x2] sm:$0x1]  ;;  %v1790_v20 = vshrl.u32 %v583_v19, 7 }
  0x54   : > { %829 = vperm.xlu2 %1274, %v825_v3   ;;  %s2022_s3 = sld [smem:[#allocation32_spill]]  ;;  %628 = vst [vmem:[#allocation3] sm:$0x1] %v1752_v9  ;;  %v1759_v11 = vld [vmem:[%s1701_s19 + $0x4] sm:$0x1]  ;;  %v587_v26 = vand.u32 127, %v583_v19 }
  0x55   : > { %v1762_v12 = vld [vmem:[%s1701_s19 + $0x6] sm:$0x1]  ;;  %650 = vst [vmem:[#allocation3 + $0x1] sm:$0x1] %v1755_v10  ;;  %v1766_v13 = vld [vmem:[%s1701_s19 + $0x8] sm:$0x1] }
  0x56   : > { %672 = vst [vmem:[#allocation3 + $0x2] sm:$0x1] %v1759_v11  ;;  %v1770_v14 = vld [vmem:[%s1701_s19 + $0xa] sm:$0x1]  ;;  %v1774_v15 = vld [vmem:[%s1701_s19 + $0xc] sm:$0x1] }
  0x57   : > { %v553_v0 = vld [vmem:[%s2020_s2 + $0x10] sm:$0x1]  ;;  %v552_v1 = vld [vmem:[%s2020_s2 + $0x8] sm:$0xff]  ;;  %v551_v5 = vld [vmem:[%s2020_s2] sm:$0xff]  ;;  %694 = vst [vmem:[#allocation3 + $0x3] sm:$0x1] %v1762_v12 }
  0x58   : > { %569 = vperm.xlu0 %1272, %v553_v0   ;;  %564 = vperm.xlu1 %1273, %v552_v1   ;;  %s544_s14 = scalar_lea.vmem %s2021_s1, %s1730_s18  ;;  %716 = vst [vmem:[#allocation3 + $0x4] sm:$0x1] %v1766_v13  ;;  %v1778_v16 = vld [vmem:[%s1701_s19 + $0xe] sm:$0x1]  ;;  %v848_v18 = vld [vmem:[%s1983_s5 + $0x8] sm:$0x1] }
  0x59   : > { %738 = vst [vmem:[#allocation3 + $0x5] sm:$0x1] %v1770_v14  ;;  %v1797_v21 = vld [vmem:[%s544_s14] ss:$0 sm:$0xff]  ;;  %v585_v22 = vadd.s32 8, %v1790_v20  ;;  %v588_v27 = vmul.u32 2, %v1790_v20 }
  0x5a   : > { %v811_v4 = vld [vmem:[%s2022_s3] sm:$0xff]  ;;  %v812_v6 = vld [vmem:[%s2022_s3 + $0x8] sm:$0x1]  ;;  %760 = vst [vmem:[#allocation3 + $0x6] sm:$0x1] %v1774_v15  ;;  %v601_v32 = vsel %vm599_vm0, 65535, %v1513_v2 }
  0x5b   : > { %782 = vst [vmem:[#allocation3 + $0x7] sm:$0x1] %v1778_v16  ;;  %v550_v24 = vld [vmem:[%s1701_s19 + $0x10] sm:$0x1]  ;;  %v589_v28 = vmul.u32 2, %v585_v22  ;;  %v549_v35 = vld [vmem:[%s1701_s19 + $0x8] sm:$0xff]  ;;  %vm590_vm2 = vcmp.lt.s32.totalorder %v587_v26, %v588_v27 }
  0x5c   : > { %820 = vperm.xlu2 %1274, %v812_v6   ;;  %804 = vst [vmem:[#allocation3 + $0x8] sm:$0x1] %v1784_v17  ;;  %v548_v38 = vld [vmem:[%s1701_s19] sm:$0xff]  ;;  %v592_v40 = vsel %vm590_vm2, 1.0, %v1514_v30  ;;  %v1515_v43 = vmov 1.0|1.0  }
  0x5d   : > { %vm591_vm3 = vcmp.lt.s32.totalorder %v587_v26, %v589_v28  ;;  %vm595_vm7 = vcmask 138240   ;;  %s547_s18 = sld [smem:[#allocation4]]  ;;  %s1808_s14 = sshll.u32 %s1697_s30, 4  ;;  %v1516_v62 = vmov 1.0   ;;  %vm805_vm9 = vcmp.eq.s32.totalorder %v1790_v20, 0 }
  0x5e   : > { %v593_v41 = vsel %vm591_vm3, 1.0, %v1514_v30  ;;  %s1811_s6 = scalar_lea.vmem [#allocation15], %s1808_s14  ;;  %s631_s19 = sld [smem:[#allocation9]] }
  0x5f   : > { %v594_v42 = vpack.c.bf16 %v593_v41, %v592_v40  ;;  %s635_s26 = sld [smem:[#allocation10]]  ;;  %s1821_s15 = scalar_lea.vmem [#allocation16], %s1808_s14 }
  0x60   : > { %815 = vperm.xlu1 %1273, %v811_v4   ;;  %559 = vperm.xlu0 %1272, %v551_v5   ;;  %s639_s25 = sld [smem:[#allocation12]]  ;;  %s1827_s21 = scalar_lea.vmem [#allocation18], %s1808_s14 }
  0x61   : > { %s644_s29 = sld [smem:[#allocation13]]  ;;  %s1836_s24 = sshll.u32 %s1614_s10, 3 }
  0x62   : > { %v809_v50 = vld [vmem:[#allocation3] sm:$0xff]  ;;  %s1127_s8 = sld [smem:[#allocation9 + $0x1]]  ;;  %s918_s1 = scalar_lea.hbm %s1991_s13, %s1836_s24 }
  0x63   : > { %v625_v44 = vstv %s547_s18  ;;  %s1818_s9 = sld [smem:[#allocation10 + $0x1]]  ;;  %v810_v20 = vld [vmem:[#allocation3 + $0x8] sm:$0x1]  ;;  %s903_s18 = sshll.u32 %s1821_s15, 4  ;;  %s1859_s18 = int_to_ptr.vmem [resolvable:$true] %s903_s18 }
  0x64   : > { %856 = vperm.xlu2 %1274, %v848_v18   ;;  %626 = vst [vmem:[%s1811_s6] sm:$0x1] %v625_v44  ;;  %v632_v45 = vstv %s631_s19  ;;  %s1824_s20 = sld [smem:[#allocation12 + $0x1]]  ;;  %s1866_s0 = sshll.u32 %s918_s1, 4  ;;  %s922_s0 = int_to_ptr.hbm [resolvable:$true] %s1866_s0 }
  0x65   : > { %v633_v46 = vmul.f32 %v632_v45, %v1752_v9  ;;  %v637_v55 = vstv %s635_s26  ;;  %s1830_s17 = sld [smem:[#allocation13 + $0x1]]  ;;  %s1386_s26 = scalar_lea.hbm %s1990_s12, 32 }
  0x66   : > { %v641_v56 = vstv %s639_s25  ;;  %s1832_s22 = sld [smem:[#allocation9 + $0x2]]  ;;  %s902_s25 = scalar_lea.hbm %s1990_s12, %s1836_s24 }
  0x67   : > { %v634_v48 = vsub.f32 %v625_v44, %v633_v46  ;;  %v645_v0 = vstv %s644_s29  ;;  %s1838_s7 = sld [smem:[#allocation13 + $0x2]]  ;;  %s870_s29 = sand.u32 1, %s1614_s10  }
  0x68   : > { %851 = vperm.xlu1 %1273, %v847_v7   ;;  %834 = vperm.xlu0 %1272, %v826_v8   ;;  %v646_v3 = vmul.f32 %v645_v0, %v1755_v10  ;;  %v654_v8 = vstv %s1127_s8  ;;  %s1846_s14 = sld [smem:[#allocation10 + $0x2]]  ;;  %s1877_s1 = scalar_lea.sflag [#allocation17], %s870_s29 }
  0x69   : > { %v636_v53 = vmax.f32 %v634_v48, 0.0  ;;  %v640_v54 = vmin.f32 %v634_v48, 0.0  ;;  %v655_v19 = vmul.f32 %v654_v8, %v1755_v10  ;;  %v659_v10 = vstv %s1818_s9  ;;  %s1857_s2 = sld [smem:[#allocation12 + $0x2]]  ;;  %s919_s9 = sshll.u32 %s1827_s21, 4  ;;  %s1871_s9 = int_to_ptr.vmem [resolvable:$true] %s919_s9 }
  0x6a   : > { %s1874_s10 = sld [smem:[#allocation9 + $0x3]] }
  0x6b   : > { %v638_v59 = vmul.f32 %v637_v55, %v636_v53  ;;  %v642_v60 = vmul.f32 %v641_v56, %v640_v54 }
  0x6d   : > { %v643_v4 = vadd.f32 %v642_v60, %v638_v59 }
  0x6f   : > { %v647_v9 = vadd.f32 %v646_v3, %v643_v4 }
  0xae   : > { %v830_v49 = vpop.permute.xlu2 %829 }
  0xaf   : > { %v837_v51 = vmul.f32 %v1797_v21, %v830_v49 }
  0xb6   : > { %v821_v18 = vpop.permute.xlu2 %820 }
  0xb7   : > { %v824_v26 = vmul.f32 %v821_v18, %v810_v20 }
  0xca   : > { %v570_v23 = vpop.permute.xlu0 %569  ;;  %v565_v29 = vpop.permute.xlu1 %564 }
  0xcb   : > { %v574_v25 = vmul.f32 %v1797_v21, %v570_v23  ;;  %v573_v33 = vmul.f32 %v1797_v21, %v565_v29  ;;  %v663_v29 = vstv %s1824_s20  ;;  %s1863_s20 = sshll.u32 %s902_s25, 4  ;;  %s906_s20 = int_to_ptr.hbm [resolvable:$true] %s1863_s20 }
  0xcd   : > { %vm577_vm1 = vcmp.le.f32.partialorder %v550_v24, %v574_v25  ;;  %vm576_vm4 = vcmp.le.f32.partialorder %v549_v35, %v573_v33 }
  0xce   : > { %v580_v31 = vsel %vm577_vm1, 1.0, %v1514_v30  ;;  %v667_v30 = vstv %s1830_s17  ;;  %s1380_s17 = sshra.s32 %s906_s20, 4  ;;  %s1381_s17 = int_to_ptr.hbm [resolvable:$true] %s1380_s17 }
  0xcf   : > { %v582_v34 = vpack.c.bf16 %v580_v31, %v580_v31  ;;  %p1387_p10 = scmp.lt.s32.totalorder %s1381_s17, %s1990_s12 }
  0xd1   : > { %v603_v36 = vand.u32 %v601_v32, %v582_v34  ;;  %v668_v34 = vmul.f32 %v667_v30, %v1759_v11 }
  0xd2   : > { %v560_v37 = vpop.permute.xlu0 %559  ;;  %v816_v47 = vpop.permute.xlu1 %815 }
  0xd3   : > { %v572_v39 = vmul.f32 %v1797_v21, %v560_v37  ;;  %611 = vmatpush.bf16.msra.mxu0 %v603_v36  ;;  %v823_v52 = vmul.f32 %v816_v47, %v809_v50  ;;  %v676_v37 = vstv %s1832_s22  ;;  %s1382_s22 = scalar_lea.hbm %s1381_s17, 16 }
  0xd4   : > { %p1383_p1 = scmp.ne.s32.totalorder %s1381_s17, %s1382_s22  ;;  %p1388_p2 = scmp.lt.s32.totalorder %s1386_s26, %s1382_s22 }
  0xd5   : > { %vm575_vm5 = vcmp.le.f32.partialorder %v548_v38, %v572_v39  ;;  %v839_v58 = vsub.f32 %v823_v52, %v837_v51 }
  0xd6   : > { %vm1124_vm6 = vmpackc.low %vm576_vm4, %vm575_vm5  ;;  %p1384_p8 = pnand %p1383_p1, %p1670_p5  ;;  %p1389_p11 = por %p1388_p2, %p1387_p10 }
  0xd7   : > { %1125 = vmatpush.bf16.msk.msra.mxu0 %vm1124_vm6, %v1515_v43 }
  0xd8   : > { %p1385_p9 = pneg %p1384_p8 }
  0xda   : > { %1126 = vmatmul.msk.bf16.vlgmr.msra.gmra.mxu0 %vm595_vm7, %v594_v42  ;;  %v852_v61 = vpop.permute.xlu1 %851  ;;  %v835_v22 = vpop.permute.xlu0 %834  ;;  %v677_v42 = vmul.f32 %v676_v37, %v1759_v11  ;;  %p1390_p12 = pnand %p1389_p11, %p1385_p9 }
  0xdb   : > { %v838_v27 = vmul.f32 %v1797_v21, %v835_v22  ;;  %v857_v21 = vpop.permute.xlu2 %856 }
  0xdd   : > { %v840_v33 = vsub.f32 %v824_v26, %v838_v27 }
 0x157   : > { %v614_v57 = vpop.f32.mrf.mxu0 }
 0x158   : > { %vm619_vm8 = vcmp.gt.f32.partialorder %v614_v57, 0.5 }
 0x159   : > { %v621_v63 = vsel %vm619_vm8, 0.0, %v1516_v62 }
 0x15a   : > { %623 = vst [vmem:[#allocation2] sm:$0xff] %v621_v63  ;;  %v841_v1 = vmul.f32 %v839_v58, %v621_v63  ;;  %v859_v2 = vmul.f32 %v852_v61, %v621_v63 }
 0x15c   : > { %v843_v5 = vsel %vm805_vm9, %v625_v44, %v841_v1  ;;  %v861_v6 = vsel %vm805_vm9, 0.0, %v859_v2 }
 0x15d   : > { %845 = vst [vmem:[%s1821_s15] sm:$0xff] %v843_v5 }
 0x15e   : > { %863 = vst [vmem:[%s1827_s21] sm:$0xff] %v861_v6 }
 0x15f   : > { %v616_v7 = vpop.f32.mrf.mxu0 }
 0x160   : > { %vm620_vm10 = vcmp.gt.f32.partialorder %v616_v7, 0.5 }
 0x161   : > { %v622_v23 = vsel %vm620_vm10, 0.0, %v1516_v62  ;;  %v630_v24 = vld [vmem:[#allocation2 + $0x1] sm:$0x1]  ;;  %v652_v44 = vld [vmem:[#allocation2 + $0x2] sm:$0x1] }
 0x162   : > { %624 = vst [vmem:[#allocation2 + $0x8] sm:$0x1] %v622_v23  ;;  %v648_v25 = vmul.f32 %v647_v9, %v630_v24 }
 0x164   : > { %649 = vst [vmem:[%s1811_s6 + $0x1] sm:$0x1] %v648_v25  ;;  %v656_v28 = vsub.f32 %v648_v25, %v655_v19 }
 0x166   : > { %v658_v31 = vmax.f32 %v656_v28, 0.0  ;;  %v662_v32 = vmin.f32 %v656_v28, 0.0 }
 0x168   : > { %v660_v35 = vmul.f32 %v659_v10, %v658_v31  ;;  %v664_v36 = vmul.f32 %v663_v29, %v662_v32 }
 0x169   : > { %v808_v38 = vld [vmem:[#allocation2 + $0x8] sm:$0x1] }
 0x16a   : > { %v665_v39 = vadd.f32 %v664_v36, %v660_v35  ;;  %v842_v40 = vmul.f32 %v840_v33, %v808_v38  ;;  %v860_v41 = vmul.f32 %v857_v21, %v808_v38 }
 0x16c   : > { %v669_v43 = vadd.f32 %v668_v34, %v665_v39  ;;  %846 = vst [vmem:[%s1821_s15 + $0x8] sm:$0x1] %v842_v40 }
 0x16d   : > { %864 = vst [vmem:[%s1827_s21 + $0x8] sm:$0x1] %v860_v41 }
 0x16e   : > { %v670_v45 = vmul.f32 %v669_v43, %v652_v44 }
 0x16f   : > { %1393 = shalt.err (!%p1390_p12)
}
 0x170   : > { %s1517_s21 = smov 128   ;;  %s1518_s29 = smov 256  }
 0x171   : > { %s1519_s3 = smov 8   ;;  %s1408_s17 = sshra.s32 %s922_s0, 4  ;;  %s1409_s17 = int_to_ptr.hbm [resolvable:$true] %s1408_s17 }
 0x172   : > { %1184 = dma.vmem_to_hbm [thread:$0]  (%p1670_p5), %s1859_s18, 256, %s906_s20, %s1877_s1, %s1517_s21, %s1518_s29, %s1519_s3  }
 0x173   : > { %s1410_s22 = scalar_lea.hbm %s1409_s17, 16  ;;  %s1414_s26 = scalar_lea.hbm %s1991_s13, 32 }
 0x174   : > { %p1411_p13 = scmp.ne.s32.totalorder %s1409_s17, %s1410_s22  ;;  %p1415_p7 = scmp.lt.s32.totalorder %s1409_s17, %s1991_s13 }
 0x175   : > { %p1416_p4 = scmp.lt.s32.totalorder %s1414_s26, %s1410_s22 }
 0x176   : > { %p1412_p0 = pnand %p1411_p13, %p1670_p5 }
 0x177   : > { %p1417_p1 = por %p1416_p4, %p1415_p7 }
 0x178   : > { %p1413_p3 = pneg %p1412_p0 }
 0x17a   : > { %p1418_p8 = pnand %p1417_p1, %p1413_p3 }
 0x17c   : > { %1421 = shalt.err (!%p1418_p8)
}
 0x17d   : > { %1185 = dma.vmem_to_hbm [thread:$0]  (%p1670_p5), %s1871_s9, 256, %s922_s0, %s1877_s1, %s1517_s21, %s1518_s29, %s1519_s3   ;;  %v678_v11 = vsub.f32 %v670_v45, %v677_v42  ;;  %v674_v58 = vld [vmem:[#allocation2 + $0x3] sm:$0x1]  ;;  %v696_v8 = vld [vmem:[#allocation2 + $0x4] sm:$0x1] }
 0x17e   : > { %671 = vst [vmem:[%s1811_s6 + $0x2] sm:$0x1] %v670_v45  ;;  %v689_v46 = vstv %s1838_s7  ;;  %v681_v47 = vstv %s1846_s14  ;;  %v685_v48 = vstv %s1857_s2  ;;  %s1138_s18 = sld [smem:[#allocation13 + $0x3]]  ;;  %v718_v30 = vld [vmem:[#allocation2 + $0x5] sm:$0x1] }
 0x17f   : > { %v680_v49 = vmax.f32 %v678_v11, 0.0  ;;  %v684_v50 = vmin.f32 %v678_v11, 0.0  ;;  %v690_v51 = vmul.f32 %v689_v46, %v1762_v12  ;;  %s1136_s20 = sld [smem:[#allocation10 + $0x3]]  ;;  %v698_v54 = vstv %s1874_s10  ;;  %v740_v43 = vld [vmem:[#allocation2 + $0x6] sm:$0x1] }
 0x180   : > { %s1137_s17 = sld [smem:[#allocation12 + $0x3]]  ;;  %v699_v56 = vmul.f32 %v698_v54, %v1762_v12 }
 0x181   : > { %v682_v52 = vmul.f32 %v681_v47, %v680_v49  ;;  %v686_v53 = vmul.f32 %v685_v48, %v684_v50  ;;  %s1139_s9 = sld [smem:[#allocation9 + $0x4]] }
 0x182   : > { %s1142_s2 = sld [smem:[#allocation13 + $0x4]] }
 0x183   : > { %v687_v55 = vadd.f32 %v686_v53, %v682_v52  ;;  %s1140_s7 = sld [smem:[#allocation10 + $0x4]] }
 0x184   : > { %v711_v61 = vstv %s1138_s18  ;;  %s1141_s14 = sld [smem:[#allocation12 + $0x4]] }
 0x185   : > { %v691_v57 = vadd.f32 %v690_v51, %v687_v55  ;;  %v703_v62 = vstv %s1136_s20  ;;  %v712_v2 = vmul.f32 %v711_v61, %v1766_v13  ;;  %s1143_s0 = sld [smem:[#allocation9 + $0x5]] }
 0x186   : > { %v707_v63 = vstv %s1137_s17  ;;  %s1146_s10 = sld [smem:[#allocation13 + $0x5]] }
 0x187   : > { %v692_v59 = vmul.f32 %v691_v57, %v674_v58  ;;  %v720_v5 = vstv %s1139_s9  ;;  %s1144_s1 = sld [smem:[#allocation10 + $0x5]] }
 0x188   : > { %v721_v6 = vmul.f32 %v720_v5, %v1766_v13  ;;  %v733_v19 = vstv %s1142_s2  ;;  %s1145_s22 = sld [smem:[#allocation12 + $0x5]] }
 0x189   : > { %693 = vst [vmem:[%s1811_s6 + $0x3] sm:$0x1] %v692_v59  ;;  %v700_v60 = vsub.f32 %v692_v59, %v699_v56  ;;  %v725_v20 = vstv %s1140_s7  ;;  %v734_v25 = vmul.f32 %v733_v19, %v1770_v14  ;;  %s1147_s19 = sld [smem:[#allocation9 + $0x6]]  ;;  %v762_v56 = vld [vmem:[#allocation2 + $0x7] sm:$0x1]  ;;  %s886_s7 = scalar_lea.hbm %s1989_s11, %s1836_s24 }
 0x18a   : > { %v729_v22 = vstv %s1141_s14  ;;  %s1150_s15 = sld [smem:[#allocation13 + $0x6]]  ;;  %s887_s14 = sshll.u32 %s1811_s6, 4  ;;  %s888_s14 = int_to_ptr.vmem [resolvable:$true] %s887_s14 }
 0x18b   : > { %v702_v0 = vmax.f32 %v700_v60, 0.0  ;;  %v706_v1 = vmin.f32 %v700_v60, 0.0  ;;  %v742_v28 = vstv %s1143_s0  ;;  %s1148_s26 = sld [smem:[#allocation10 + $0x6]]  ;;  %s889_s0 = sshll.u32 %s886_s7, 4  ;;  %s890_s0 = int_to_ptr.hbm [resolvable:$true] %s889_s0 }
 0x18c   : > { %v743_v10 = vmul.f32 %v742_v28, %v1770_v14  ;;  %v755_v21 = vstv %s1146_s10  ;;  %s1149_s25 = sld [smem:[#allocation12 + $0x6]]  ;;  %s866_s10 = scalar_lea.sflag [#allocation7], %s1697_s30 }
 0x18d   : > { %v704_v3 = vmul.f32 %v703_v62, %v702_v0  ;;  %v708_v4 = vmul.f32 %v707_v63, %v706_v1  ;;  %v747_v33 = vstv %s1144_s1  ;;  %v756_v37 = vmul.f32 %v755_v21, %v1774_v15  ;;  %s1151_s8 = sld [smem:[#allocation9 + $0x7]]  ;;  %s1436_s1 = sshra.s32 %s890_s0, 4  ;;  %s1437_s1 = int_to_ptr.hbm [resolvable:$true] %s1436_s1 }
 0x18e   : > { %v751_v34 = vstv %s1145_s22  ;;  %s1154_s18 = sld [smem:[#allocation13 + $0x7]]  ;;  %s1438_s22 = scalar_lea.hbm %s1437_s1, 16 }
 0x18f   : > { %v709_v12 = vadd.f32 %v708_v4, %v704_v3  ;;  %v764_v40 = vstv %s1147_s19  ;;  %s1152_s20 = sld [smem:[#allocation10 + $0x7]]  ;;  %v784_v4 = vld [vmem:[#allocation2 + $0x8] sm:$0x1]  ;;  %p1439_p9 = scmp.ne.s32.totalorder %s1437_s1, %s1438_s22 }
 0x190   : > { %v765_v41 = vmul.f32 %v764_v40, %v1774_v15  ;;  %v777_v11 = vstv %s1150_s15  ;;  %s1153_s17 = sld [smem:[#allocation12 + $0x7]]  ;;  %s1442_s24 = scalar_lea.hbm %s1989_s11, 32 }
 0x191   : > { %v713_v7 = vadd.f32 %v712_v2, %v709_v12  ;;  %v769_v46 = vstv %s1148_s26  ;;  %v778_v50 = vmul.f32 %v777_v11, %v1778_v16  ;;  %p1440_p10 = pnand %p1439_p9, %p1670_p5  ;;  %p1443_p11 = scmp.lt.s32.totalorder %s1437_s1, %s1989_s11 }
 0x192   : > { %v773_v47 = vstv %s1149_s25  ;;  %p1444_p12 = scmp.lt.s32.totalorder %s1442_s24, %s1438_s22 }
 0x193   : > { %v714_v9 = vmul.f32 %v713_v7, %v696_v8  ;;  %v786_v53 = vstv %s1151_s8  ;;  %p1441_p2 = pneg %p1440_p10 }
 0x194   : > { %v787_v54 = vmul.f32 %v786_v53, %v1778_v16  ;;  %v799_v59 = vstv %s1154_s18  ;;  %p1445_p13 = por %p1444_p12, %p1443_p11 }
 0x195   : > { %715 = vst [vmem:[%s1811_s6 + $0x4] sm:$0x1] %v714_v9  ;;  %v722_v18 = vsub.f32 %v714_v9, %v721_v6  ;;  %v791_v60 = vstv %s1152_s20  ;;  %v800_v0 = vmul.f32 %v799_v59, %v1784_v17 }
 0x196   : > { %v795_v61 = vstv %s1153_s17  ;;  %p1446_p0 = pnand %p1445_p13, %p1441_p2 }
 0x197   : > { %v724_v23 = vmax.f32 %v722_v18, 0.0  ;;  %v728_v24 = vmin.f32 %v722_v18, 0.0 }
 0x199   : > { %v726_v26 = vmul.f32 %v725_v20, %v724_v23  ;;  %v730_v27 = vmul.f32 %v729_v22, %v728_v24 }
 0x19b   : > { %v731_v13 = vadd.f32 %v730_v27, %v726_v26 }
 0x19d   : > { %v735_v29 = vadd.f32 %v734_v25, %v731_v13 }
 0x19f   : > { %v736_v31 = vmul.f32 %v735_v29, %v718_v30 }
 0x1a1   : > { %737 = vst [vmem:[%s1811_s6 + $0x5] sm:$0x1] %v736_v31  ;;  %v744_v32 = vsub.f32 %v736_v31, %v743_v10 }
 0x1a3   : > { %v746_v35 = vmax.f32 %v744_v32, 0.0  ;;  %v750_v36 = vmin.f32 %v744_v32, 0.0 }
 0x1a5   : > { %v748_v38 = vmul.f32 %v747_v33, %v746_v35  ;;  %v752_v39 = vmul.f32 %v751_v34, %v750_v36 }
 0x1a7   : > { %v753_v14 = vadd.f32 %v752_v39, %v748_v38 }
 0x1a9   : > { %v757_v42 = vadd.f32 %v756_v37, %v753_v14 }
 0x1ab   : > { %v758_v44 = vmul.f32 %v757_v42, %v740_v43 }
 0x1ad   : > { %759 = vst [vmem:[%s1811_s6 + $0x6] sm:$0x1] %v758_v44  ;;  %v766_v45 = vsub.f32 %v758_v44, %v765_v41 }
 0x1af   : > { %v768_v48 = vmax.f32 %v766_v45, 0.0  ;;  %v772_v49 = vmin.f32 %v766_v45, 0.0 }
 0x1b1   : > { %v770_v51 = vmul.f32 %v769_v46, %v768_v48  ;;  %v774_v52 = vmul.f32 %v773_v47, %v772_v49 }
 0x1b3   : > { %v775_v15 = vadd.f32 %v774_v52, %v770_v51 }
 0x1b5   : > { %v779_v55 = vadd.f32 %v778_v50, %v775_v15 }
 0x1b7   : > { %v780_v57 = vmul.f32 %v779_v55, %v762_v56 }
 0x1b9   : > { %781 = vst [vmem:[%s1811_s6 + $0x7] sm:$0x1] %v780_v57  ;;  %v788_v58 = vsub.f32 %v780_v57, %v787_v54 }
 0x1bb   : > { %v790_v62 = vmax.f32 %v788_v58, 0.0  ;;  %v794_v63 = vmin.f32 %v788_v58, 0.0 }
 0x1bd   : > { %v792_v1 = vmul.f32 %v791_v60, %v790_v62  ;;  %v796_v2 = vmul.f32 %v795_v61, %v794_v63 }
 0x1bf   : > { %v797_v16 = vadd.f32 %v796_v2, %v792_v1 }
 0x1c1   : > { %v801_v3 = vadd.f32 %v800_v0, %v797_v16 }
 0x1c3   : > { %v802_v5 = vmul.f32 %v801_v3, %v784_v4 }
 0x1c5   : > { %803 = vst [vmem:[%s1811_s6 + $0x8] sm:$0x1] %v802_v5 }
 0x1c6   : > { %1449 = shalt.err (!%p1446_p0)
}
 0x1c7   : > { %1183 = dma.vmem_to_hbm [thread:$0]  (%p1670_p5), %s888_s14, 256, %s890_s0, %s866_s10, %s1517_s21, %s1518_s29, %s1519_s3  }
 0x1c8 PF: > { %s2023_s30 = sld [smem:[#allocation26_spill]]  ;;  %s936_s6 = sand.u32 1, %s1492_s27  }
 0x1c9   : > { %s937_s8 = scalar_lea.sflag [#allocation7], %s936_s6 }
 0x1ce   : > { %p2024_p3 = scmp.ge.s32.totalorder %s2023_s30, 2 }
 0x1d0   : > { %p1207_p7 = pnand %p2024_p3, %p1630_p6 }
 0x1d2   : > { %p1208_p4 = pneg %p1207_p7 }
 0x1d4   : > { %1483 = dma.done.wait (%p1208_p4), %s937_s8, 256  }
 0x1d5   : > { %1485 = vsyncadd (%p1208_p4), %s937_s8, 4294967040  ;;  %s2025_s18 = sadd.s32 4294967294, %s2023_s30  }
 0x1d6   : > { %s946_s20 = sand.u32 1, %s2025_s18  }
 0x1d7   : > { %s947_s23 = scalar_lea.sflag [#allocation17], %s946_s20 }
 0x1d8   : > { %1487 = dma.done.wait (%p1208_p4), %s947_s23, 512  }
 0x1d9   : > { %1489 = vsyncadd (%p1208_p4), %s947_s23, 4294966784  ;;  %s2026_s30 = sld [smem:[#allocation27_spill]]  ;;  %s2029_s27 = smov %s1496_s28 }
 0x1da   : > { %s2027_s3 = sld [smem:[#allocation25_spill]] }
 0x1db   : > { %s2028_s29 = sld [smem:[#allocation28_spill]] }
 0x1df   : > { %p34_p5 = scmp.ge.s32.totalorder %s2026_s30, 4  }
 0x1e0   : > { %s2030_s28 = smov %s2027_s3 }
 0x1e1   :  { %36 = sbr.rel (!%p34_p5) target bundleno = 20 (0x14), region = 161 }
 0x1e6   :  { %963 = vsyncpa [#allocation6], 1 }
 0x1e7   :  { %965 = vsyncpa [#allocation6 + $0x1], 1 }
 0x1e8   :  { %966 = vsyncpa [#allocation7], 1 }
 0x1e9   :  { %968 = vsyncpa [#allocation7 + $0x1], 1 }
 0x1ea   :  { %969 = vsyncpa [#allocation17], 1 }
 0x1eb   :  { %971 = vsyncpa [#allocation17 + $0x1], 1 }
 0x1ec   :  { %972 = vsyncpa [#allocation8], 1 }
 0x1ed   :  { %974 = vsyncpa [#allocation8 + $0x1], 1 }
 0x1ee   :  { %975 = vsyncpa [#allocation11], 1 }
 0x1ef   :  { %976 = vsyncpa [#allocation14], 1 }

</bundles_post_ra>
